<compile_context>
chip_gen: v5e
topology: v5e:2x2
jax: 0.10.0
libtpu: 0.0.40
codegen_flags: <defaults>
</compile_context>

<pallas_src>
import functools
import math

import jax
import jax.numpy as jnp
from jax.experimental import pallas as pl
from jax.experimental.pallas import tpu as pltpu


def _bigate1d_kernel(f1_ref, f2_ref, m12_ref, m21_ref, bb_ref, ba_ref,
                     o1_ref, o2_ref, *, prec1, prec2):
    # f1_ref: (TR, W1), f2_ref: (TR, W2)  -- W = S*C, lane-dense flattened layout.
    # m12_ref: (W1, W2), m21_ref: (W2, W1) resident VMEM gate matrices.
    # bb_ref / ba_ref: (1, 1) biases in SMEM.
    x1 = f1_ref[...]                                   # native dtype
    x2 = f2_ref[...]

    # 1x1 conv over channels + broadcast into the OTHER stream's layout, as one
    # block-structured matmul on the MXU.  Accumulate in f32, sigmoid in f32 (EUP).
    logit_from_1 = jnp.dot(x1, m12_ref[...], precision=prec1,
                           preferred_element_type=jnp.float32) + bb_ref[0, 0]   # (TR, W2)
    logit_from_2 = jnp.dot(x2, m21_ref[...], precision=prec2,
                           preferred_element_type=jnp.float32) + ba_ref[0, 0]   # (TR, W1)

    gate_for_1 = jax.nn.sigmoid(logit_from_2)          # feat2_scale, in feat1 layout
    gate_for_2 = jax.nn.sigmoid(logit_from_1)          # feat1_scale, in feat2 layout

    # Cross-gating; keep the big tiles in native dtype (only the gate is cast).
    o1_ref[...] = (x1 * gate_for_1.astype(x1.dtype)).astype(o1_ref.dtype)
    o2_ref[...] = (x2 * gate_for_2.astype(x2.dtype)).astype(o2_ref.dtype)


def _positions_per_row(c1, c2):
    """Smallest S such that S*C1 and S*C2 are both multiples of 128 (lane width)."""
    s1 = 128 // math.gcd(128, c1)
    s2 = 128 // math.gcd(128, c2)
    return max(s1, s2)          # both are powers of two dividing 128 -> lcm == max


def _gate_matrix(w, c_src, c_dst, s, dtype):
    """(s*c_src, s*c_dst) block-diagonal-per-position matrix carrying the 1x1 conv
    weights, so x_src @ M gives the per-position logit broadcast across the
    destination stream's c_dst lanes of the same position."""
    w = jnp.asarray(w, jnp.float32).reshape(c_src)
    i = jnp.arange(s * c_src)
    j = jnp.arange(s * c_dst)
    same_pos = (i[:, None] // c_src) == (j[None, :] // c_dst)
    return jnp.where(same_pos, w[i % c_src][:, None], 0.0).astype(dtype)


def _choose_block_rows(R, B, w1, w2, isz1, isz2, vmem_budget_bytes):
    """Pick the row tile TR: as large as the VMEM budget allows, multiple of 8,
    preferring a divisor of R, and split when B == 1 so megacore has >= 2 steps."""
    # Double-buffered in+out feature tiles + f32 gate/logit temporaries per row.
    per_row = 2 * 2 * (w1 * isz1 + w2 * isz2) + 8 * (w1 + w2)
    tr = int(vmem_budget_bytes // max(per_row, 1))
    tr = max(8, (tr // 8) * 8)
    if tr >= R:
        if B >= 2 or R <= 16:
            return R
        # Single batch element: split rows so both v7x TensorCores get work.
        half = (((R + 1) // 2) + 7) // 8 * 8
        return min(half, R)
    # Snap down to a divisor of R so the last block isn't ragged (keeps every
    # store fully dense); only if a divisor is reasonably close.
    d = tr
    while d >= max(8, (2 * tr) // 3):
        if R % d == 0:
            return d
        d -= 8
    return tr


@functools.partial(jax.jit, static_argnames=("block_rows", "vmem_budget_bytes"))
def bigate1d(feat1, feat2, w_b, b_b, w_a, b_a, *,
             block_rows=None, vmem_budget_bytes=16 * 1024 * 1024):
    """feat1: (B, L, C1), feat2: (B, L, C2).  Returns
    (feat1 * sigmoid(conv_a(feat2)), feat2 * sigmoid(conv_b(feat1))),
    matching BiGate1D.forward (channel-last inputs/outputs)."""
    B, L, C1 = feat1.shape
    B2, L2, C2 = feat2.shape
    assert B2 == B and L2 == L, "feat1/feat2 must share batch and sequence dims"

    S = _positions_per_row(C1, C2)
    W1, W2 = S * C1, S * C2

    # Pad L up to a multiple of S if needed (rare; costs one extra pass).  For
    # L % S == 0 the reshape below is a free, layout-preserving view.
    Lp = ((L + S - 1) // S) * S
    if Lp != L:
        pad = ((0, 0), (0, Lp - L), (0, 0))
        feat1 = jnp.pad(feat1, pad)
        feat2 = jnp.pad(feat2, pad)
    R = Lp // S

    f1_r = feat1.reshape(B, R, W1)      # free reshape of contiguous minor dims
    f2_r = feat2.reshape(B, R, W2)

    # Gate matrices (tiny, resident in VMEM) and SMEM biases.
    # TODO(synk): for odd channel counts S can reach 128 and W1*W2 grows; a
    # sublane-reduce variant would be preferable there (not needed for CenterPoint's
    # small gate channels).
    m12 = _gate_matrix(w_b, C1, C2, S, f1_r.dtype)     # gate FROM feat1 (b_conv1d)
    m21 = _gate_matrix(w_a, C2, C1, S, f2_r.dtype)     # gate FROM feat2 (a_conv1d)
    bb = jnp.asarray(b_b, jnp.float32).reshape(1, 1)
    ba = jnp.asarray(b_a, jnp.float32).reshape(1, 1)

    i1 = jnp.dtype(f1_r.dtype).itemsize
    i2 = jnp.dtype(f2_r.dtype).itemsize
    if block_rows is None:
        tr = _choose_block_rows(R, B, W1, W2, i1, i2, vmem_budget_bytes)
    else:
        tr = int(block_rows)
        assert tr == R or tr % 8 == 0, "block_rows must be a multiple of 8 or == R"

    grid = (B, pl.cdiv(R, tr))

    # Exact f32 gate math when features are f32; native MXU path for bf16.
    prec1 = (jax.lax.Precision.HIGHEST if f1_r.dtype == jnp.float32
             else jax.lax.Precision.DEFAULT)
    prec2 = (jax.lax.Precision.HIGHEST if f2_r.dtype == jnp.float32
             else jax.lax.Precision.DEFAULT)
    kernel = functools.partial(_bigate1d_kernel, prec1=prec1, prec2=prec2)

    cost = pl.CostEstimate(
        flops=4 * B * R * W1 * W2 + 2 * B * Lp * (C1 + C2),
        transcendentals=B * R * (W1 + W2),
        bytes_accessed=2 * B * Lp * (C1 * i1 + C2 * i2) + W1 * W2 * (i1 + i2),
    )

    o1_r, o2_r = pl.pallas_call(
        kernel,
        out_shape=(jax.ShapeDtypeStruct((B, R, W1), f1_r.dtype),
                   jax.ShapeDtypeStruct((B, R, W2), f2_r.dtype)),
        grid=grid,
        in_specs=[
            pl.BlockSpec((None, tr, W1), lambda b, r: (b, r, 0)),   # feat1 rows
            pl.BlockSpec((None, tr, W2), lambda b, r: (b, r, 0)),   # feat2 rows
            pl.BlockSpec((W1, W2), lambda b, r: (0, 0)),            # M12, resident
            pl.BlockSpec((W2, W1), lambda b, r: (0, 0)),            # M21, resident
            pl.BlockSpec(memory_space=pltpu.SMEM),                  # b_b (1,1)
            pl.BlockSpec(memory_space=pltpu.SMEM),                  # b_a (1,1)
        ],
        out_specs=(pl.BlockSpec((None, tr, W1), lambda b, r: (b, r, 0)),
                   pl.BlockSpec((None, tr, W2), lambda b, r: (b, r, 0))),
        compiler_params=pltpu.CompilerParams(
            dimension_semantics=("parallel", "parallel"),
            vmem_limit_bytes=32 * 1024 * 1024),
        cost_estimate=cost,
    )(f1_r, f2_r, m12, m21, bb, ba)

    out1 = o1_r.reshape(B, Lp, C1)      # free reshape back to channel-last
    out2 = o2_r.reshape(B, Lp, C2)
    if Lp != L:
        out1 = out1[:, :L]
        out2 = out2[:, :L]
    return out1, out2


def _reference(feat1, feat2, w_b, b_b, w_a, b_a):
    # Exact f32 reference (elementwise multiply + reduce; no MXU).
    f1 = feat1.astype(jnp.float32)
    f2 = feat2.astype(jnp.float32)
    s1 = jax.nn.sigmoid(jnp.sum(f1 * w_b.astype(jnp.float32), axis=-1, keepdims=True) + b_b)
    s2 = jax.nn.sigmoid(jnp.sum(f2 * w_a.astype(jnp.float32), axis=-1, keepdims=True) + b_a)
    return (f1 * s2).astype(feat1.dtype), (f2 * s1).astype(feat2.dtype)


if __name__ == "__main__":
    key = jax.random.PRNGKey(0)
    k1, k2, k3, k4, k5, k6 = jax.random.split(key, 6)

    # g_channel = 8, g_channel_ = 16 (channel counts may differ in BiGate1D).
    B, L, C1, C2 = 2, 384, 8, 16

    feat1 = jax.random.normal(k1, (B, L, C1), dtype=jnp.float32)
    feat2 = jax.random.normal(k2, (B, L, C2), dtype=jnp.float32)
    w_b = jax.random.normal(k3, (C1,), dtype=jnp.float32) * 0.1
    b_b = jax.random.normal(k4, (), dtype=jnp.float32) * 0.1
    w_a = jax.random.normal(k5, (C2,), dtype=jnp.float32) * 0.1
    b_a = jax.random.normal(k6, (), dtype=jnp.float32) * 0.1

    ref1, ref2 = _reference(feat1, feat2, w_b, b_b, w_a, b_a)

    # Default tiling: S=16 -> R=24 rows per batch, single row-block, grid (2, 1).
    out1, out2 = bigate1d(feat1, feat2, w_b, b_b, w_a, b_a)
    jax.block_until_ready((out1, out2))
    assert out1.shape == (B, L, C1) and out2.shape == (B, L, C2)
    assert jnp.allclose(out1, ref1, atol=2e-5, rtol=2e-5)
    assert jnp.allclose(out2, ref2, atol=2e-5, rtol=2e-5)

    # Multi-tile path: 8-row blocks -> grid (2, 3).
    out1b, out2b = bigate1d(feat1, feat2, w_b, b_b, w_a, b_a, block_rows=8)
    jax.block_until_ready((out1b, out2b))
    assert jnp.allclose(out1b, ref1, atol=2e-5, rtol=2e-5)
    assert jnp.allclose(out2b, ref2, atol=2e-5, rtol=2e-5)

    # Ragged final block: 16-row blocks over R=24 -> grid (2, 2), last block masked.
    out1c, out2c = bigate1d(feat1, feat2, w_b, b_b, w_a, b_a, block_rows=16)
    jax.block_until_ready((out1c, out2c))
    assert jnp.allclose(out1c, ref1, atol=2e-5, rtol=2e-5)
    assert jnp.allclose(out2c, ref2, atol=2e-5, rtol=2e-5)

    print("KERNEL_OK")
</pallas_src>

<mosaic_0001>
module attributes {stable_mosaic.version = 11 : i64} {
  func.func @_bigate1d_kernel(%arg0: i32, %arg1: i32, %arg2: memref<1x24x128xf32, #tpu.memory_space<vmem>>, %arg3: memref<1x24x256xf32, #tpu.memory_space<vmem>>, %arg4: memref<128x256xf32, #tpu.memory_space<vmem>>, %arg5: memref<256x128xf32, #tpu.memory_space<vmem>>, %arg6: memref<1x1xf32, #tpu.memory_space<smem>>, %arg7: memref<1x1xf32, #tpu.memory_space<smem>>, %arg8: memref<1x24x128xf32, #tpu.memory_space<vmem>>, %arg9: memref<1x24x256xf32, #tpu.memory_space<vmem>>) attributes {dimension_semantics = [#tpu.dimension_semantics<parallel>, #tpu.dimension_semantics<parallel>], iteration_bounds = array<i64: 2, 1>, scalar_prefetch = 0 : i64, scratch_operands = 0 : i64, tpu.core_type = #tpu.core_type<tc>, window_params = [{transform_indices = @transform_0, window_bounds = array<i64: 1, 24, 128>}, {transform_indices = @transform_1, window_bounds = array<i64: 1, 24, 256>}, {pipeline_mode = #tpu.pipeline_mode<synchronous>, transform_indices = @transform_2, window_bounds = array<i64: 128, 256>}, {pipeline_mode = #tpu.pipeline_mode<synchronous>, transform_indices = @transform_3, window_bounds = array<i64: 256, 128>}, {transform_indices = @transform_4, window_bounds = array<i64: 1, 1>}, {transform_indices = @transform_5, window_bounds = array<i64: 1, 1>}, {transform_indices = @transform_6, window_bounds = array<i64: 1, 24, 128>}, {transform_indices = @transform_7, window_bounds = array<i64: 1, 24, 256>}]} {
    %c0 = arith.constant 0 : index
    %c0_0 = arith.constant 0 : index
    %c0_1 = arith.constant 0 : index
    %0 = vector.load %arg2[%c0, %c0_0, %c0_1] : memref<1x24x128xf32, #tpu.memory_space<vmem>>, vector<1x24x128xf32>
    %1 = vector.shape_cast %0 : vector<1x24x128xf32> to vector<24x128xf32>
    %c0_2 = arith.constant 0 : index
    %c0_3 = arith.constant 0 : index
    %c0_4 = arith.constant 0 : index
    %2 = vector.load %arg3[%c0_2, %c0_3, %c0_4] : memref<1x24x256xf32, #tpu.memory_space<vmem>>, vector<1x24x256xf32>
    %3 = vector.shape_cast %2 : vector<1x24x256xf32> to vector<24x256xf32>
    %c0_5 = arith.constant 0 : index
    %c0_6 = arith.constant 0 : index
    %4 = vector.load %arg4[%c0_5, %c0_6] : memref<128x256xf32, #tpu.memory_space<vmem>>, vector<128x256xf32>
    %cst = arith.constant dense<0.000000e+00> : vector<24x256xf32>
    %5 = tpu.matmul %1, %4, %cst {dimension_numbers = #tpu.dot_dimension_numbers<[1], [0], [0], [1], [0, 0, 1, 1], [], []>, precision = #tpu.contract_precision<fp32>} : vector<24x128xf32>, vector<128x256xf32>, vector<24x256xf32> -> vector<24x256xf32>
    %c0_7 = arith.constant 0 : index
    %c0_8 = arith.constant 0 : index
    %6 = memref.load %arg6[%c0_7, %c0_8] : memref<1x1xf32, #tpu.memory_space<smem>>
    %7 = vector.broadcast %6 : f32 to vector<24x256xf32>
    %8 = arith.addf %5, %7 : vector<24x256xf32>
    %c0_9 = arith.constant 0 : index
    %c0_10 = arith.constant 0 : index
    %9 = vector.load %arg5[%c0_9, %c0_10] : memref<256x128xf32, #tpu.memory_space<vmem>>, vector<256x128xf32>
    %cst_11 = arith.constant dense<0.000000e+00> : vector<24x128xf32>
    %10 = tpu.matmul %3, %9, %cst_11 {dimension_numbers = #tpu.dot_dimension_numbers<[1], [0], [0], [1], [0, 0, 1, 1], [], []>, precision = #tpu.contract_precision<fp32>} : vector<24x256xf32>, vector<256x128xf32>, vector<24x128xf32> -> vector<24x128xf32>
    %c0_12 = arith.constant 0 : index
    %c0_13 = arith.constant 0 : index
    %11 = memref.load %arg7[%c0_12, %c0_13] : memref<1x1xf32, #tpu.memory_space<smem>>
    %12 = vector.broadcast %11 : f32 to vector<24x128xf32>
    %13 = arith.addf %10, %12 : vector<24x128xf32>
    %14 = arith.negf %13 : vector<24x128xf32>
    %15 = math.exp %14 : vector<24x128xf32>
    %cst_14 = arith.constant 1.000000e+00 : f32
    %16 = vector.broadcast %cst_14 : f32 to vector<24x128xf32>
    %17 = arith.addf %16, %15 : vector<24x128xf32>
    %18 = arith.divf %16, %17 : vector<24x128xf32>
    %19 = arith.negf %8 : vector<24x256xf32>
    %20 = math.exp %19 : vector<24x256xf32>
    %cst_15 = arith.constant 1.000000e+00 : f32
    %21 = vector.broadcast %cst_15 : f32 to vector<24x256xf32>
    %22 = arith.addf %21, %20 : vector<24x256xf32>
    %23 = arith.divf %21, %22 : vector<24x256xf32>
    %24 = arith.mulf %1, %18 : vector<24x128xf32>
    %c0_16 = arith.constant 0 : index
    %c0_17 = arith.constant 0 : index
    %c0_18 = arith.constant 0 : index
    %25 = vector.load %arg8[%c0_16, %c0_17, %c0_18] : memref<1x24x128xf32, #tpu.memory_space<vmem>>, vector<1x24x128xf32>
    %26 = vector.shape_cast %25 : vector<1x24x128xf32> to vector<24x128xf32>
    %27 = vector.shape_cast %24 : vector<24x128xf32> to vector<1x24x128xf32>
    tpu.vector_store %arg8[%c0_16, %c0_17, %c0_18], %27 {strides = array<i32>} : memref<1x24x128xf32, #tpu.memory_space<vmem>>, vector<1x24x128xf32>,
    %28 = arith.mulf %3, %23 : vector<24x256xf32>
    %c0_19 = arith.constant 0 : index
    %c0_20 = arith.constant 0 : index
    %c0_21 = arith.constant 0 : index
    %29 = vector.load %arg9[%c0_19, %c0_20, %c0_21] : memref<1x24x256xf32, #tpu.memory_space<vmem>>, vector<1x24x256xf32>
    %30 = vector.shape_cast %29 : vector<1x24x256xf32> to vector<24x256xf32>
    %31 = vector.shape_cast %28 : vector<24x256xf32> to vector<1x24x256xf32>
    tpu.vector_store %arg9[%c0_19, %c0_20, %c0_21], %31 {strides = array<i32>} : memref<1x24x256xf32, #tpu.memory_space<vmem>>, vector<1x24x256xf32>,
    return
  }
  func.func @transform_0(%arg0: i32, %arg1: i32) -> (i32, i32, i32) {
    %c0_i32 = arith.constant 0 : i32
    %c0_i32_0 = arith.constant 0 : i32
    return %arg0, %arg1, %c0_i32 : i32, i32, i32
  }
  func.func @transform_1(%arg0: i32, %arg1: i32) -> (i32, i32, i32) {
    %c0_i32 = arith.constant 0 : i32
    %c0_i32_0 = arith.constant 0 : i32
    return %arg0, %arg1, %c0_i32 : i32, i32, i32
  }
  func.func @transform_2(%arg0: i32, %arg1: i32) -> (i32, i32) {
    %c0_i32 = arith.constant 0 : i32
    %c0_i32_0 = arith.constant 0 : i32
    %c0_i32_1 = arith.constant 0 : i32
    return %c0_i32, %c0_i32_0 : i32, i32
  }
  func.func @transform_3(%arg0: i32, %arg1: i32) -> (i32, i32) {
    %c0_i32 = arith.constant 0 : i32
    %c0_i32_0 = arith.constant 0 : i32
    %c0_i32_1 = arith.constant 0 : i32
    return %c0_i32, %c0_i32_0 : i32, i32
  }
  func.func @transform_4(%arg0: i32, %arg1: i32) -> (i32, i32) {
    %c0_i32 = arith.constant 0 : i32
    %c0_i32_0 = arith.constant 0 : i32
    %c0_i32_1 = arith.constant 0 : i32
    return %c0_i32, %c0_i32_0 : i32, i32
  }
  func.func @transform_5(%arg0: i32, %arg1: i32) -> (i32, i32) {
    %c0_i32 = arith.constant 0 : i32
    %c0_i32_0 = arith.constant 0 : i32
    %c0_i32_1 = arith.constant 0 : i32
    return %c0_i32, %c0_i32_0 : i32, i32
  }
  func.func @transform_6(%arg0: i32, %arg1: i32) -> (i32, i32, i32) {
    %c0_i32 = arith.constant 0 : i32
    %c0_i32_0 = arith.constant 0 : i32
    return %arg0, %arg1, %c0_i32 : i32, i32, i32
  }
  func.func @transform_7(%arg0: i32, %arg1: i32) -> (i32, i32, i32) {
    %c0_i32 = arith.constant 0 : i32
    %c0_i32_0 = arith.constant 0 : i32
    return %arg0, %arg1, %c0_i32 : i32, i32, i32
  }
}

</mosaic_0001>

<bundles_post_ra>
// kernel: bigate1d.1
= control target key start
LH: loop header
LB: loop body
LE: loop exit
PB: predicated region body
PF: predicated region fallthrough
CT: control target
= control target key end

     0   :  { %s2582_s28 = smov 0   ;;  %s2584_s29 = smov 0   ;;  %s4023_s0 = inlined_call_operand.vmem [shape: f32[2,24,128], index: 0, kind: input, shape index: {}]   ;;  %s4024_s1 = inlined_call_operand.vmem [shape: f32[2,24,256], index: 1, kind: input, shape index: {}]   ;;  %s4025_s2 = inlined_call_operand.vmem [shape: f32[128,256], index: 2, kind: input, shape index: {}]   ;;  %s4026_s3 = inlined_call_operand.vmem [shape: f32[256,128], index: 3, kind: input, shape index: {}]   ;;  %s4027_s4 = inlined_call_operand.<no memory space> [shape: f32[1,1], index: 4, kind: input, shape index: {}]   ;;  %s4028_s5 = inlined_call_operand.<no memory space> [shape: f32[1,1], index: 5, kind: input, shape index: {}]   ;;  %s4029_s6 = inlined_call_operand.vmem [shape: f32[2,24,128], index: 6, kind: output, shape index: {0}]   ;;  %s4030_s7 = inlined_call_operand.vmem [shape: f32[2,24,256], index: 7, kind: output, shape index: {1}]  }
   0x1   :  { %13 = sst [smem:[#allocation2]] %s4027_s4  ;;  %s2586_s30 = smov 0  }
   0x2   :  { %14 = sst [smem:[#allocation3]] %s4028_s5 }
   0x3 LB: > { %s32_s4 = sadd.s32 1, %s2530_s29  ;;  %p2431_p0 = scmp.ge.s32.totalorder %s2534_s30, 1  ;;  %s2534_s30 = sphi %s2586_s30, %s20_s30   ;;  %s2530_s29 = sphi %s2584_s29, %s4166_s29   ;;  %s2526_s28 = sphi %s2582_s28, %s4165_s28  }
   0x4   : > { %p34_p1 = scmp.ge.s32.totalorder %s32_s4, 2  ;;  %p283_p2 = scmp.lt.s32.totalorder %s2534_s30, 3 }
   0x6   : > { %s4168_s4 = smov (%p34_p1, %s32_s4), 0  ;;  %p284_p3 = pnand %p2431_p0, %p283_p2 }
   0x8   : > { %287 = sbr.rel (%p284_p3) target bundleno = 423 (0x1a7), region = 44 }
   0xd   : > { %v424_v0 = vld [vmem:[%s4025_s2 + $0xf0] sm:$0xff]  ;;  %v422_v1 = vld [vmem:[%s4025_s2 + $0xe0] sm:$0xff]  ;;  %p344_p4 = scmp.lt.s32.totalorder %s2526_s28, 1  ;;  %v425_v59 = vld [vmem:[%s4025_s2 + $0xf8] sm:$0xff]  ;;  %s426_s10 = sld [smem:[#allocation2]] }
   0xe   : > { %v420_v2 = vld [vmem:[%s4025_s2 + $0xd0] sm:$0xff]  ;;  %v2611_v3 = vand.u32 4294901760, %v424_v0  ;;  %v2613_v4 = vand.u32 4294901760, %v422_v1  ;;  %v418_v6 = vld [vmem:[%s4025_s2 + $0xc0] sm:$0xff] }
   0xf   : > { %v2615_v5 = vand.u32 4294901760, %v420_v2  ;;  %v416_v7 = vld [vmem:[%s4025_s2 + $0xb0] sm:$0xff]  ;;  %v414_v8 = vld [vmem:[%s4025_s2 + $0xa0] sm:$0xff]  ;;  %v2626_v9 = vand.u32 4294901760, %v418_v6  ;;  %s4170_s28 = smov (!%p344_p4, %s2526_s28), 1 }
  0x10   : > { %v2628_v10 = vand.u32 4294901760, %v416_v7  ;;  %v2630_v11 = vand.u32 4294901760, %v414_v8  ;;  %v412_v12 = vld [vmem:[%s4025_s2 + $0x90] sm:$0xff]  ;;  %v410_v13 = vld [vmem:[%s4025_s2 + $0x80] sm:$0xff]  ;;  %429 = vmatpush.msra.mxu0 %v2611_v3  ;;  %v2640_v14 = vsub.f32 %v424_v0, %v2611_v3  ;;  %v2643_v15 = vsub.f32 %v422_v1, %v2613_v4  ;;  %659 = vmatpush.msra.mxu3 %v2611_v3  ;;  %s2447_s22 = smul.u32 24, %s4170_s28 }
  0x11   : > { %v2647_v16 = vsub.f32 %v420_v2, %v2615_v5  ;;  %v2649_v17 = vand.u32 4294901760, %v412_v12  ;;  %v2652_v18 = vsub.f32 %v418_v6, %v2626_v9  ;;  %v408_v21 = vld [vmem:[%s4025_s2 + $0x70] sm:$0xff]  ;;  %v2668_v25 = vand.u32 4294901760, %v410_v13  ;;  %v406_v26 = vld [vmem:[%s4025_s2 + $0x60] sm:$0xff]  ;;  %v423_v6 = vld [vmem:[%s4025_s2 + $0xe8] sm:$0xff]  ;;  %s2448_s19 = smul.u32 48, %s4170_s28 }
  0x12   : > { %v2655_v19 = vsub.f32 %v416_v7, %v2628_v10  ;;  %v2658_v20 = vsub.f32 %v414_v8, %v2630_v11  ;;  %431 = vmatpush.msra.mxu0 %v2613_v4  ;;  %596 = vmatpush.msra.mxu2 %v2640_v14  ;;  %v487_v22 = vand.u32 4294901760, %v2640_v14  ;;  %v493_v23 = vand.u32 4294901760, %v2643_v15  ;;  %v404_v36 = vld [vmem:[%s4025_s2 + $0x50] sm:$0xff]  ;;  %v402_v42 = vld [vmem:[%s4025_s2 + $0x40] sm:$0xff]  ;;  %s2818_s27 = scalar_lea.vmem %s4023_s0, %s2447_s22  ;;  %s4006_s15 = scalar_lea.vmem %s4029_s6, %s2447_s22 }
  0x13   : > { %v4046_v24 = vand.u32 4294901760, %v2647_v16  ;;  %661 = vmatpush.msra.mxu3 %v2613_v4  ;;  %v4043_v27 = vand.u32 4294901760, %v2652_v18  ;;  %v2677_v29 = vsub.f32 %v412_v12, %v2649_v17  ;;  %v2690_v33 = vand.u32 4294901760, %v408_v21  ;;  %v400_v47 = vld [vmem:[%s4025_s2 + $0x30] sm:$0xff]  ;;  %v398_v54 = vld [vmem:[%s4025_s2 + $0x20] sm:$0xff]  ;;  %s3417_s5 = scalar_lea.vmem %s4024_s1, %s2448_s19  ;;  %s3976_s12 = scalar_lea.vmem %s4030_s7, %s2448_s19 }
  0x14   : > { %v4042_v28 = vand.u32 4294901760, %v2655_v19  ;;  %433 = vmatpush.msra.mxu0 %v2615_v5  ;;  %599 = vmatpush.msra.mxu2 %v2643_v15  ;;  %v488_v30 = vsub.f32 %v2640_v14, %v487_v22  ;;  %v494_v31 = vsub.f32 %v2643_v15, %v493_v23  ;;  %v2693_v34 = vand.u32 4294901760, %v406_v26  ;;  %v396_v61 = vld [vmem:[%s4025_s2 + $0x10] sm:$0xff]  ;;  %v394_v2 = vld [vmem:[%s4025_s2] sm:$0xff]  ;;  %s1266_s19 = sld [smem:[#allocation3]] }
  0x15   : > { %v500_v32 = vsub.f32 %v2647_v16, %v4046_v24  ;;  %663 = vmatpush.msra.mxu3 %v2615_v5  ;;  %v4038_v35 = vand.u32 4294901760, %v2658_v20  ;;  %v506_v39 = vsub.f32 %v2652_v18, %v4043_v27  ;;  %v2705_v40 = vsub.f32 %v410_v13, %v2668_v25  ;;  %v411_v27 = vld [vmem:[%s4025_s2 + $0x88] sm:$0xff] }
  0x16   : > { %435 = vmatpush.msra.mxu0 %v2626_v9  ;;  %v489_v37 = vand.u32 4294901760, %v488_v30  ;;  %602 = vmatpush.msra.mxu2 %v2647_v16  ;;  %v495_v38 = vand.u32 4294901760, %v494_v31  ;;  %v512_v41 = vsub.f32 %v2655_v19, %v4042_v28  ;;  %v2716_v44 = vand.u32 4294901760, %v404_v36 }
  0x17   : > { %665 = vmatpush.msra.mxu3 %v2626_v9  ;;  %v501_v43 = vand.u32 4294901760, %v500_v32  ;;  %v4037_v45 = vand.u32 4294901760, %v2677_v29  ;;  %v2720_v46 = vsub.f32 %v408_v21, %v2690_v33  ;;  %v518_v48 = vsub.f32 %v2658_v20, %v4038_v35  ;;  %v421_v32 = vld [vmem:[%s4025_s2 + $0xd8] sm:$0xff] }
  0x18   : > { %437 = vmatpush.msra.mxu0 %v2628_v10  ;;  %490 = vmatpush.msra.mxu1 %v489_v37  ;;  %v507_v49 = vand.u32 4294901760, %v506_v39  ;;  %v2731_v50 = vand.u32 4294901760, %v402_v42  ;;  %v4036_v51 = vand.u32 4294901760, %v2705_v40  ;;  %v2735_v52 = vsub.f32 %v406_v26, %v2693_v34 }
  0x19   : > { %605 = vmatpush.msra.mxu2 %v2652_v18  ;;  %667 = vmatpush.msra.mxu3 %v2628_v10  ;;  %v2744_v53 = vand.u32 4294901760, %v400_v47  ;;  %v513_v55 = vand.u32 4294901760, %v512_v41  ;;  %v524_v56 = vsub.f32 %v2677_v29, %v4037_v45  ;;  %v4035_v57 = vand.u32 4294901760, %v2720_v46 }
  0x1a   : > { %439 = vmatpush.msra.mxu0 %v2630_v11  ;;  %496 = vmatpush.msra.mxu1 %v495_v38  ;;  %v2755_v58 = vsub.f32 %v404_v36, %v2716_v44  ;;  %v519_v60 = vand.u32 4294901760, %v518_v48  ;;  %v530_v62 = vsub.f32 %v2705_v40, %v4036_v51  ;;  %v2769_v63 = vand.u32 4294901760, %v398_v54 }
  0x1b   : > { %608 = vmatpush.msra.mxu2 %v2655_v19  ;;  %669 = vmatpush.msra.mxu3 %v2630_v11  ;;  %v4034_v0 = vand.u32 4294901760, %v2735_v52  ;;  %v2773_v1 = vsub.f32 %v402_v42, %v2731_v50  ;;  %v2785_v7 = vsub.f32 %v400_v47, %v2744_v53  ;;  %v2787_v8 = vand.u32 4294901760, %v425_v59 }
  0x1c   : > { %441 = vmatpush.msra.mxu0 %v2649_v17  ;;  %502 = vmatpush.msra.mxu1 %v501_v43  ;;  %v525_v12 = vand.u32 4294901760, %v524_v56  ;;  %v536_v13 = vsub.f32 %v2720_v46, %v4035_v57  ;;  %v2793_v21 = vand.u32 4294901760, %v396_v61  ;;  %v4032_v26 = vand.u32 4294901760, %v2755_v58  ;;  %v419_v43 = vld [vmem:[%s4025_s2 + $0xc8] sm:$0xff] }
  0x1d   : > { %611 = vmatpush.msra.mxu2 %v2658_v20  ;;  %671 = vmatpush.msra.mxu3 %v2649_v17  ;;  %v2798_v30 = vand.u32 4294901760, %v394_v2  ;;  %v2800_v31 = vand.u32 4294901760, %v423_v6  ;;  %v531_v36 = vand.u32 4294901760, %v530_v62  ;;  %v542_v37 = vsub.f32 %v2735_v52, %v4034_v0 }
  0x1e   : > { %443 = vmatpush.msra.mxu0 %v2668_v25  ;;  %508 = vmatpush.msra.mxu1 %v507_v49  ;;  %v4031_v38 = vand.u32 4294901760, %v2773_v1  ;;  %v2811_v39 = vsub.f32 %v398_v54, %v2769_v63  ;;  %v4033_v41 = vand.u32 4294901760, %v2785_v7  ;;  %v2824_v42 = vsub.f32 %v425_v59, %v2787_v8  ;;  %v385_v59 = vld [vmem:[%s2818_s27] sm:$0xff] }
  0x1f   : > { %614 = vmatpush.msra.mxu2 %v2677_v29  ;;  %673 = vmatpush.msra.mxu3 %v2668_v25  ;;  %4086 = vst [vmem:[#allocation4_spill] sm:$0xff] %v2798_v30  ;;  %v537_v47 = vand.u32 4294901760, %v536_v13  ;;  %v548_v48 = vsub.f32 %v2755_v58, %v4032_v26  ;;  %v2834_v49 = vsub.f32 %v396_v61, %v2793_v21  ;;  %v2836_v54 = vand.u32 4294901760, %v421_v32  ;;  %v417_v13 = vld [vmem:[%s4025_s2 + $0xb8] sm:$0xff] }
  0x20   : > { %445 = vmatpush.msra.mxu0 %v2690_v33  ;;  %514 = vmatpush.msra.mxu1 %v513_v55  ;;  %v2841_v55 = vsub.f32 %v394_v2, %v2798_v30  ;;  %v2844_v56 = vsub.f32 %v423_v6, %v2800_v31  ;;  %v554_v61 = vsub.f32 %v2773_v1, %v4031_v38  ;;  %v4039_v62 = vand.u32 4294901760, %v2811_v39 }
  0x21   : > { %617 = vmatpush.msra.mxu2 %v2705_v40  ;;  %675 = vmatpush.msra.mxu3 %v2690_v33  ;;  %v560_v2 = vsub.f32 %v2785_v7, %v4033_v41  ;;  %v4040_v6 = vand.u32 4294901760, %v2824_v42  ;;  %v2866_v38 = vsub.f32 %v421_v32, %v2836_v54  ;;  %v2868_v26 = vand.u32 4294901760, %v385_v59 }
  0x22   : > { %447 = vmatpush.msra.mxu0 %v2693_v34  ;;  %520 = vmatpush.msra.mxu1 %v519_v60  ;;  %v543_v60 = vand.u32 4294901760, %v542_v37  ;;  %v4041_v37 = vand.u32 4294901760, %v2834_v49  ;;  %v4045_v41 = vand.u32 4294901760, %v2841_v55  ;;  %v4044_v0 = vand.u32 4294901760, %v2844_v56 }
  0x23   : > { %620 = vmatpush.msra.mxu2 %v2720_v46  ;;  %677 = vmatpush.msra.mxu3 %v2693_v34  ;;  %v566_v32 = vsub.f32 %v2811_v39, %v4039_v62  ;;  %v2881_v57 = vand.u32 4294901760, %v417_v13  ;;  %v561_v45 = vand.u32 4294901760, %v560_v2  ;;  %v891_v35 = vsub.f32 %v2824_v42, %v4040_v6  ;;  %v413_v2 = vld [vmem:[%s4025_s2 + $0x98] sm:$0xff] }
  0x24   : > { %449 = vmatpush.msra.mxu0 %v2716_v44  ;;  %526 = vmatpush.msra.mxu1 %v525_v12  ;;  %v2852_v12 = vand.u32 4294901760, %v419_v43  ;;  %v578_v6 = vsub.f32 %v2841_v55, %v4045_v41 }
  0x25   : > { %623 = vmatpush.msra.mxu2 %v2735_v52  ;;  %679 = vmatpush.msra.mxu3 %v2716_v44  ;;  %4087 = vst [vmem:[#allocation5_spill] sm:$0xff] %v2881_v57  ;;  %v2915_v28 = vsub.f32 %v417_v13, %v2881_v57 }
  0x26   : > { %451 = vmatpush.msra.mxu0 %v2731_v50  ;;  %532 = vmatpush.msra.mxu1 %v531_v36  ;;  %v549_v36 = vand.u32 4294901760, %v548_v48  ;;  %v555_v48 = vand.u32 4294901760, %v554_v61  ;;  %v2884_v51 = vsub.f32 %v419_v43, %v2852_v12  ;;  %v4047_v61 = vand.u32 4294901760, %v2866_v38 }
  0x27   : > { %626 = vmatpush.msra.mxu2 %v2755_v58  ;;  %681 = vmatpush.msra.mxu3 %v2731_v50  ;;  %v2897_v43 = vsub.f32 %v385_v59, %v2868_v26  ;;  %v567_v59 = vand.u32 4294901760, %v566_v32  ;;  %v2923_v32 = vand.u32 4294901760, %v413_v2 }
  0x28   : > { %453 = vmatpush.msra.mxu0 %v2744_v53  ;;  %538 = vmatpush.msra.mxu1 %v537_v47  ;;  %v415_v47 = vld [vmem:[%s4025_s2 + $0xa8] sm:$0xff]  ;;  %v903_v13 = vsub.f32 %v2866_v38, %v4047_v61 }
  0x29   : > { %629 = vmatpush.msra.mxu2 %v2773_v1  ;;  %683 = vmatpush.msra.mxu3 %v2744_v53  ;;  %v2899_v62 = vand.u32 4294901760, %v415_v47  ;;  %v2931_v24 = vand.u32 4294901760, %v2897_v43  ;;  %v2954_v61 = vsub.f32 %v413_v2, %v2923_v32 }
  0x2a   : > { %455 = vmatpush.msra.mxu0 %v2769_v63  ;;  %544 = vmatpush.msra.mxu1 %v543_v60  ;;  %v572_v60 = vsub.f32 %v2834_v49, %v4041_v37  ;;  %v4048_v37 = vand.u32 4294901760, %v2884_v51 }
  0x2b   : > { %632 = vmatpush.msra.mxu2 %v2785_v7  ;;  %685 = vmatpush.msra.mxu3 %v2769_v63  ;;  %4088 = vst [vmem:[#allocation6_spill] sm:$0xff] %v2899_v62  ;;  %v2934_v14 = vsub.f32 %v415_v47, %v2899_v62 }
  0x2c   : > { %457 = vmatpush.msra.mxu0 %v2793_v21  ;;  %550 = vmatpush.msra.mxu1 %v549_v36  ;;  %v897_v36 = vsub.f32 %v2844_v56, %v4044_v0  ;;  %v386_v0 = vld [vmem:[%s2818_s27 + $0x8] sm:$0xff]  ;;  %v573_v41 = vand.u32 4294901760, %v572_v60  ;;  %v579_v60 = vand.u32 4294901760, %v578_v6  ;;  %v909_v47 = vsub.f32 %v2884_v51, %v4048_v37 }
  0x2d   : > { %635 = vmatpush.msra.mxu2 %v2811_v39  ;;  %687 = vmatpush.msra.mxu3 %v2793_v21  ;;  %v904_v6 = vand.u32 4294901760, %v903_v13  ;;  %v463_v37 = vsub.f32 %v2897_v43, %v2931_v24 }
  0x2e   : > { %459 = vmatpush.msra.mxu0 %v2798_v30  ;;  %556 = vmatpush.msra.mxu1 %v555_v48  ;;  %v892_v48 = vand.u32 4294901760, %v891_v35  ;;  %v2939_v35 = vand.u32 4294901760, %v411_v27 }
  0x2f   : > { %638 = vmatpush.msra.mxu2 %v2834_v49  ;;  %689 = vmatpush.msra.mxu3 %v2798_v30 }
  0x30   : > { %712 = vmatpush.msrb.mxu0 %v487_v22  ;;  %562 = vmatpush.msra.mxu1 %v561_v45  ;;  %v898_v22 = vand.u32 4294901760, %v897_v36  ;;  %v409_v45 = vld [vmem:[%s4025_s2 + $0x78] sm:$0xff]  ;;  %v4089_v36 = vand.u32 4294901760, %v2647_v16  ;;  %v4090_v16 = vand.u32 4294901760, %v2652_v18  ;;  %v2968_v2 = vsub.f32 %v411_v27, %v2939_v35 }
  0x31   : > { %641 = vmatpush.msra.mxu2 %v2841_v55  ;;  %893 = vmatpush.msrb.mxu3 %v892_v48  ;;  %v2963_v30 = vand.u32 4294901760, %v409_v45  ;;  %v4091_v48 = vand.u32 4294901760, %v2915_v28  ;;  %v405_v18 = vld [vmem:[%s4025_s2 + $0x58] sm:$0xff]  ;;  %v4092_v27 = vand.u32 4294901760, %v2655_v19  ;;  %v403_v19 = vld [vmem:[%s4025_s2 + $0x48] sm:$0xff] }
  0x32   : > { %716 = vmatpush.msrb.mxu0 %v493_v23  ;;  %568 = vmatpush.msra.mxu1 %v567_v59  ;;  %v2949_v23 = vand.u32 4294901760, %v386_v0  ;;  %v407_v59 = vld [vmem:[%s4025_s2 + $0x68] sm:$0xff] }
  0x33   : > { %832 = vmatpush.msrb.mxu2 %v2787_v8  ;;  %899 = vmatpush.msrb.mxu3 %v898_v22  ;;  %v915_v13 = vsub.f32 %v2915_v28, %v4091_v48  ;;  %v2977_v15 = vand.u32 4294901760, %v407_v59  ;;  %v4050_v22 = vand.u32 4294901760, %v2954_v61  ;;  %v387_v48 = vld [vmem:[%s2818_s27 + $0x10] sm:$0xff] }
  0x34   : > { %720 = vmatpush.msrb.mxu0 %v4089_v36  ;;  %574 = vmatpush.msra.mxu1 %v573_v41  ;;  %v910_v41 = vand.u32 4294901760, %v909_v47  ;;  %v2975_v36 = vsub.f32 %v386_v0, %v2949_v23  ;;  %v4093_v0 = vand.u32 4294901760, %v2934_v14 }
  0x35   : > { %834 = vmatpush.msrb.mxu2 %v2800_v31  ;;  %905 = vmatpush.msrb.mxu3 %v904_v6  ;;  %v4051_v6 = vand.u32 4294901760, %v2968_v2 }
  0x36   : > { %724 = vmatpush.msrb.mxu0 %v4090_v16  ;;  %580 = vmatpush.msra.mxu1 %v579_v60  ;;  %v2987_v60 = vand.u32 4294901760, %v463_v37  ;;  %v921_v47 = vsub.f32 %v2934_v14, %v4093_v0  ;;  %v2993_v16 = vsub.f32 %v409_v45, %v2963_v30  ;;  %v3002_v37 = vand.u32 4294901760, %v405_v18 }
  0x37   : > { %836 = vmatpush.msrb.mxu2 %v2836_v54  ;;  %911 = vmatpush.msrb.mxu3 %v910_v41  ;;  %v3007_v45 = vand.u32 4294901760, %v2975_v36  ;;  %v3010_v0 = vsub.f32 %v407_v59, %v2977_v15  ;;  %v401_v41 = vld [vmem:[%s4025_s2 + $0x38] sm:$0xff] }
  0x38   : > { %728 = vmatpush.msrb.mxu0 %v4092_v27  ;;  %787 = vmatpush.msrb.mxu1 %v2611_v3  ;;  %v4094_v3 = vand.u32 4294901760, %v2658_v20  ;;  %v916_v27 = vand.u32 4294901760, %v915_v13  ;;  %v4095_v20 = vand.u32 4294901760, %v2677_v29  ;;  %v922_v59 = vand.u32 4294901760, %v921_v47  ;;  %v399_v47 = vld [vmem:[%s4025_s2 + $0x28] sm:$0xff] }
  0x39   : > { %838 = vmatpush.msrb.mxu2 %v2852_v12  ;;  %465 = vmatmul.f32.vlgmr.msra.gmra.mxu0 %v2987_v60  ;;  %v3026_v13 = vand.u32 4294901760, %v387_v48  ;;  %v4097_v29 = vand.u32 4294901760, %v2720_v46  ;;  %v4099_v46 = vand.u32 4294901760, %v2735_v52  ;;  %v395_v52 = vld [vmem:[%s4025_s2 + $0x8] sm:$0xff] }
  0x3a   : > { %732 = vmatpush.msrb.mxu0 %v4094_v3  ;;  %789 = vmatpush.msrb.mxu1 %v2613_v4  ;;  %v927_v4 = vsub.f32 %v2954_v61, %v4050_v22  ;;  %v3018_v3 = vand.u32 4294901760, %v403_v19  ;;  %v3035_v22 = vsub.f32 %v405_v18, %v3002_v37 }
  0x3b   : > { %840 = vmatpush.msrb.mxu2 %v2881_v57  ;;  %917 = vmatpush.msrb.mxu3 %v916_v27  ;;  %v4098_v27 = vand.u32 4294901760, %v2993_v16  ;;  %v3059_v57 = vand.u32 4294901760, %v399_v47 }
  0x3c   : > { %736 = vmatpush.msrb.mxu0 %v4095_v20  ;;  %791 = vmatpush.msrb.mxu1 %v2615_v5  ;;  %v4096_v5 = vand.u32 4294901760, %v2705_v40  ;;  %v933_v20 = vsub.f32 %v2968_v2, %v4051_v6  ;;  %v471_v40 = vsub.f32 %v2975_v36, %v3007_v45  ;;  %v928_v18 = vand.u32 4294901760, %v927_v4 }
  0x3d   : > { %842 = vmatpush.msrb.mxu2 %v2899_v62  ;;  %582 = vmatmul.f32.vlgmr.msra.gmra.mxu1 %v2868_v26  ;;  %v3050_v6 = vsub.f32 %v403_v19, %v3018_v3  ;;  %v939_v62 = vsub.f32 %v2993_v16, %v4098_v27  ;;  %v4056_v4 = vand.u32 4294901760, %v3035_v22 }
  0x3e   : > { %740 = vmatpush.msrb.mxu0 %v4096_v5  ;;  %793 = vmatpush.msrb.mxu1 %v2626_v9  ;;  %v3044_v9 = vand.u32 4294901760, %v401_v41  ;;  %v3057_v5 = vsub.f32 %v387_v48, %v3026_v13  ;;  %v934_v19 = vand.u32 4294901760, %v933_v20  ;;  %v3070_v48 = vand.u32 4294901760, %v471_v40 }
  0x3f   : > { %844 = vmatpush.msrb.mxu2 %v2923_v32  ;;  %923 = vmatpush.msrb.mxu3 %v922_v59  ;;  %v4100_v59 = vand.u32 4294901760, %v3010_v0  ;;  %v4101_v20 = vand.u32 4294901760, %v2755_v58  ;;  %v940_v40 = vand.u32 4294901760, %v939_v62  ;;  %v951_v58 = vsub.f32 %v3035_v22, %v4056_v4 }
  0x40   : > { %744 = vmatpush.msrb.mxu0 %v4097_v29  ;;  %795 = vmatpush.msrb.mxu1 %v2628_v10  ;;  %v397_v10 = vld [vmem:[%s4025_s2 + $0x18] sm:$0xff]  ;;  %v3076_v27 = vsub.f32 %v401_v41, %v3044_v9  ;;  %v3089_v41 = vand.u32 4294901760, %v3057_v5 }
  0x41   : > { %644 = vmatmul.f32.vlgmr.msra.gmra.mxu2 %v2897_v43  ;;  %v945_v29 = vsub.f32 %v3010_v0, %v4100_v59  ;;  %929 = vmatpush.msrb.mxu3 %v928_v18  ;;  %v3092_v59 = vsub.f32 %v399_v47, %v3059_v57  ;;  %v3098_v18 = vand.u32 4294901760, %v395_v52 }
  0x42   : > { %748 = vmatpush.msrb.mxu0 %v4099_v46  ;;  %797 = vmatpush.msrb.mxu1 %v2630_v11  ;;  %v956_v11 = vand.u32 4294901760, %v3050_v6  ;;  %v3084_v46 = vand.u32 4294901760, %v397_v10  ;;  %v962_v62 = vand.u32 4294901760, %v3076_v27 }
  0x43   : > { %846 = vmatpush.msrb.mxu2 %v2939_v35  ;;  %693 = vmatmul.f32.vlgmr.msra.gmra.mxu3 %v2931_v24  ;;  %v3120_v4 = vsub.f32 %v395_v52, %v3098_v18 }
  0x44   : > { %752 = vmatpush.msrb.mxu0 %v4101_v20  ;;  %799 = vmatpush.msrb.mxu1 %v2649_v17  ;;  %v946_v17 = vand.u32 4294901760, %v945_v29  ;;  %v4102_v20 = vand.u32 4294901760, %v2773_v1  ;;  %v957_v47 = vsub.f32 %v3050_v6, %v956_v11  ;;  %v968_v29 = vand.u32 4294901760, %v3092_v59 }
  0x45   : > { %848 = vmatpush.msrb.mxu2 %v2963_v30  ;;  %935 = vmatpush.msrb.mxu3 %v934_v19  ;;  %v3110_v19 = vsub.f32 %v397_v10, %v3084_v46  ;;  %v4103_v1 = vand.u32 4294901760, %v2785_v7  ;;  %v963_v10 = vsub.f32 %v3076_v27, %v962_v62 }
  0x46   : > { %473 = vmatmul.f32.gmra.mxu0 %v3070_v48  ;;  %801 = vmatpush.msrb.mxu1 %v2668_v25  ;;  %v479_v25 = vsub.f32 %v3057_v5, %v3089_v41  ;;  %v958_v7 = vand.u32 4294901760, %v957_v47  ;;  %v969_v52 = vsub.f32 %v3092_v59, %v968_v29  ;;  %v4106_v47 = vand.u32 4294901760, %v2841_v55 }
  0x47   : > { %756 = vmatpush.msrb.mxu0 %v4102_v20  ;;  %850 = vmatpush.msrb.mxu2 %v2977_v15  ;;  %v952_v20 = vand.u32 4294901760, %v951_v58  ;;  %v4105_v58 = vand.u32 4294901760, %v2834_v49  ;;  %v4107_v55 = vand.u32 4294901760, %v2824_v42 }
  0x48   : > { %941 = vmatpush.msrb.mxu3 %v940_v40  ;;  %586 = vmatmul.f32.gmra.mxu1 %v2949_v23  ;;  %v4104_v40 = vand.u32 4294901760, %v2811_v39  ;;  %v980_v39 = vand.u32 4294901760, %v3120_v4  ;;  %v970_v49 = vand.u32 4294901760, %v969_v52 }
  0x49   : > { %760 = vmatpush.msrb.mxu0 %v4103_v1  ;;  %803 = vmatpush.msrb.mxu1 %v2690_v33  ;;  %v974_v1 = vand.u32 4294901760, %v3110_v19  ;;  %v3132_v33 = vand.u32 4294901760, %v479_v25 }
  0x4a   : > { %852 = vmatpush.msrb.mxu2 %v3002_v37  ;;  %947 = vmatpush.msrb.mxu3 %v946_v17  ;;  %v964_v17 = vand.u32 4294901760, %v963_v10  ;;  %v1242_v10 = vld [vmem:[%s4026_s3 + $0x40] sm:$0xff] }
  0x4b   : > { %649 = vmatmul.f32.gmra.mxu2 %v2975_v36  ;;  %764 = vmatpush.msrb.mxu0 %v4104_v40 }
  0x4c   : > { %805 = vmatpush.msrb.mxu1 %v2693_v34  ;;  %854 = vmatpush.msrb.mxu2 %v3018_v3  ;;  %v975_v34 = vsub.f32 %v3110_v19, %v974_v1 }
  0x4d   : > { %953 = vmatpush.msrb.mxu3 %v952_v20  ;;  %768 = vmatpush.msrb.mxu0 %v4105_v58  ;;  %v4110_v20 = vand.u32 4294901760, %v2866_v38 }
  0x4e   : > { %699 = vmatmul.f32.gmra.mxu3 %v3007_v45  ;;  %807 = vmatpush.msrb.mxu1 %v2716_v44  ;;  %v981_v44 = vsub.f32 %v3120_v4, %v980_v39  ;;  %v976_v25 = vand.u32 4294901760, %v975_v34 }
  0x4f   : > { %856 = vmatpush.msrb.mxu2 %v3044_v9  ;;  %959 = vmatpush.msrb.mxu3 %v958_v7 }
  0x50   : > { %481 = vmatmul.f32.gmra.mxu0 %v3132_v33  ;;  %809 = vmatpush.msrb.mxu1 %v2731_v50  ;;  %v982_v50 = vand.u32 4294901760, %v981_v44 }
  0x51   : > { %772 = vmatpush.msrb.mxu0 %v4106_v47  ;;  %858 = vmatpush.msrb.mxu2 %v3059_v57  ;;  %v1239_v47 = vld [vmem:[%s4026_s3 + $0x28] sm:$0xff] }
  0x52   : > { %965 = vmatpush.msrb.mxu3 %v964_v17  ;;  %590 = vmatmul.f32.gmra.mxu1 %v3026_v13 }
  0x53   : > { %999 = vmatpush.msra.mxu0 %v2824_v42  ;;  %811 = vmatpush.msrb.mxu1 %v2744_v53  ;;  %v4108_v53 = vand.u32 4294901760, %v2844_v56  ;;  %v4117_v42 = vand.u32 4294901760, %v2968_v2 }
  0x54   : > { %860 = vmatpush.msrb.mxu2 %v3084_v46  ;;  %971 = vmatpush.msrb.mxu3 %v970_v49 }
  0x55   : > { %1002 = vmatpush.msra.mxu0 %v2844_v56  ;;  %654 = vmatmul.f32.gmra.mxu2 %v3057_v5  ;;  %v1249_v56 = vld [vmem:[%s4026_s3 + $0x78] sm:$0xff] }
  0x56   : > { %813 = vmatpush.msrb.mxu1 %v2769_v63  ;;  %862 = vmatpush.msrb.mxu2 %v3098_v18  ;;  %v4109_v63 = vld [vmem:[#allocation4_spill] sm:$0xff] }
  0x57   : > { %977 = vmatpush.msrb.mxu3 %v976_v25  ;;  %1005 = vmatpush.msra.mxu0 %v2866_v38  ;;  %v4112_v38 = vand.u32 4294901760, %v2915_v28 }
  0x58   : > { %1115 = vmatpush.msra.mxu2 %v4107_v55  ;;  %705 = vmatmul.f32.gmra.mxu3 %v3089_v41  ;;  %v1238_v55 = vld [vmem:[%s4026_s3 + $0x20] sm:$0xff] }
  0x59   : > { %815 = vmatpush.msrb.mxu1 %v2793_v21  ;;  %983 = vmatpush.msrb.mxu3 %v982_v50  ;;  %v4111_v21 = vand.u32 4294901760, %v2884_v51 }
  0x5a   : > { %774 = vmatmul.f32.vlgmr.msrb.gmra.mxu0 %v2868_v26  ;;  %1119 = vmatpush.msra.mxu2 %v4108_v53 }
  0x5b   : > { %1008 = vmatpush.msra.mxu0 %v2884_v51  ;;  %1190 = vmatpush.msra.mxu3 %v2787_v8  ;;  %v4113_v51 = vand.u32 4294901760, %v2934_v14 }
  0x5c   : > { %817 = vmatpush.msrb.mxu1 %v4109_v63  ;;  %1123 = vmatpush.msra.mxu2 %v4110_v20  ;;  %v3379_v20 = vand.u32 4294901760, %v1239_v47 }
  0x5d   : > { %819 = vmatmul.f32.vlgmr.msrb.gmra.mxu1 %v2868_v26  ;;  %1011 = vmatpush.msra.mxu0 %v2915_v28  ;;  %v4115_v28 = vand.u32 4294901760, %v2954_v61 }
  0x5e   : > { %1062 = vmatpush.msra.mxu1 %v2787_v8  ;;  %1192 = vmatpush.msra.mxu3 %v2800_v31  ;;  %v4114_v8 = vld [vmem:[#allocation5_spill] sm:$0xff] }
  0x5f   : > { %1014 = vmatpush.msra.mxu0 %v2934_v14  ;;  %1127 = vmatpush.msra.mxu2 %v4111_v21  ;;  %v4120_v14 = vand.u32 4294901760, %v3035_v22 }
  0x60   : > { %1064 = vmatpush.msra.mxu1 %v2800_v31  ;;  %1194 = vmatpush.msra.mxu3 %v2836_v54  ;;  %v4116_v31 = vld [vmem:[#allocation6_spill] sm:$0xff] }
  0x61   : > { %868 = vmatmul.f32.vlgmr.msrb.gmra.mxu2 %v2987_v60  ;;  %1017 = vmatpush.msra.mxu0 %v2954_v61  ;;  %v1248_v61 = vld [vmem:[%s4026_s3 + $0x70] sm:$0xff] }
  0x62   : > { %1066 = vmatpush.msra.mxu1 %v2836_v54  ;;  %1131 = vmatpush.msra.mxu2 %v4112_v38  ;;  %v4118_v54 = vand.u32 4294901760, %v2993_v16  ;;  %v1237_v38 = vld [vmem:[%s4026_s3 + $0x18] sm:$0xff] }
  0x63   : > { %1196 = vmatpush.msra.mxu3 %v2852_v12  ;;  %778 = vmatmul.f32.gmra.mxu0 %v2949_v23 }
  0x64   : > { %985 = vmatmul.f32.vlgmr.msrb.gmra.mxu3 %v2868_v26  ;;  %1020 = vmatpush.msra.mxu0 %v2968_v2  ;;  %v3240_v2 = vand.u32 4294901760, %v1248_v61 }
  0x65   : > { %1068 = vmatpush.msra.mxu1 %v2852_v12  ;;  %1135 = vmatpush.msra.mxu2 %v4113_v51  ;;  %v4119_v12 = vand.u32 4294901760, %v3010_v0 }
  0x66   : > { %1198 = vmatpush.msra.mxu3 %v4114_v8  ;;  %823 = vmatmul.f32.gmra.mxu1 %v2949_v23  ;;  %v3261_v60 = vsub.f32 %v1248_v61, %v3240_v2 }
  0x67   : > { %1023 = vmatpush.msra.mxu0 %v2993_v16  ;;  %1070 = vmatpush.msra.mxu1 %v4114_v8  ;;  %v1245_v16 = vld [vmem:[%s4026_s3 + $0x58] sm:$0xff]  ;;  %v3391_v8 = vand.u32 4294901760, %v1238_v55 }
  0x68   : > { %1139 = vmatpush.msra.mxu2 %v4115_v28  ;;  %1200 = vmatpush.msra.mxu3 %v4116_v31 }
  0x69   : > { %1026 = vmatpush.msra.mxu0 %v3010_v0  ;;  %1072 = vmatpush.msra.mxu1 %v4116_v31 }
  0x6a   : > { %1143 = vmatpush.msra.mxu2 %v4117_v42  ;;  %1202 = vmatpush.msra.mxu3 %v2923_v32 }
  0x6b   : > { %876 = vmatmul.f32.gmra.mxu2 %v3070_v48  ;;  %1029 = vmatpush.msra.mxu0 %v3035_v22  ;;  %v1244_v48 = vld [vmem:[%s4026_s3 + $0x50] sm:$0xff] }
  0x6c   : > { %1074 = vmatpush.msra.mxu1 %v2923_v32  ;;  %1147 = vmatpush.msra.mxu2 %v4118_v54  ;;  %v3230_v32 = vand.u32 4294901760, %v1249_v56 }
  0x6d   : > { %1204 = vmatpush.msra.mxu3 %v2939_v35  ;;  %782 = vmatmul.f32.gmra.mxu0 %v3026_v13 }
  0x6e   : > { %989 = vmatmul.f32.gmra.mxu3 %v2949_v23  ;;  %1032 = vmatpush.msra.mxu0 %v3050_v6  ;;  %v3250_v22 = vsub.f32 %v1249_v56, %v3230_v32  ;;  %v3406_v56 = vand.u32 4294901760, %v1237_v38 }
  0x6f   : > { %1076 = vmatpush.msra.mxu1 %v2939_v35  ;;  %1151 = vmatpush.msra.mxu2 %v4119_v12  ;;  %v1247_v35 = vld [vmem:[%s4026_s3 + $0x68] sm:$0xff] }
  0x70   : > { %1206 = vmatpush.msra.mxu3 %v2963_v30  ;;  %827 = vmatmul.f32.gmra.mxu1 %v3026_v13 }
  0x71   : > { %1035 = vmatpush.msra.mxu0 %v3076_v27  ;;  %1078 = vmatpush.msra.mxu1 %v2963_v30  ;;  %v3247_v30 = vand.u32 4294901760, %v1247_v35  ;;  %v1333_v27 = vand.u32 4294901760, %v3261_v60 }
  0x72   : > { %1155 = vmatpush.msra.mxu2 %v4120_v14  ;;  %1208 = vmatpush.msra.mxu3 %v2977_v15 }
  0x73   : > { %1038 = vmatpush.msra.mxu0 %v3092_v59  ;;  %1080 = vmatpush.msra.mxu1 %v2977_v15  ;;  %v1246_v15 = vld [vmem:[%s4026_s3 + $0x60] sm:$0xff]  ;;  %v3275_v0 = vsub.f32 %v1247_v35, %v3247_v30 }
  0x74   : > { %1159 = vmatpush.msra.mxu2 %v956_v11  ;;  %1210 = vmatpush.msra.mxu3 %v3002_v37  ;;  %v3268_v6 = vand.u32 4294901760, %v1246_v15  ;;  %v3290_v11 = vand.u32 4294901760, %v1244_v48 }
  0x75   : > { %884 = vmatmul.f32.gmra.mxu2 %v3132_v33  ;;  %1041 = vmatpush.msra.mxu0 %v3110_v19  ;;  %v1241_v33 = vld [vmem:[%s4026_s3 + $0x38] sm:$0xff] }
  0x76   : > { %1082 = vmatpush.msra.mxu1 %v3002_v37  ;;  %1163 = vmatpush.msra.mxu2 %v962_v62  ;;  %v1327_v37 = vand.u32 4294901760, %v3250_v22  ;;  %v3293_v59 = vsub.f32 %v1246_v15, %v3268_v6  ;;  %v3324_v7 = vsub.f32 %v1244_v48, %v3290_v11  ;;  %v3352_v34 = vand.u32 4294901760, %v1241_v33 }
  0x77   : > { %1212 = vmatpush.msra.mxu3 %v3018_v3  ;;  %1044 = vmatpush.msra.mxu0 %v3120_v4  ;;  %v1334_v4 = vsub.f32 %v3261_v60, %v1333_v27  ;;  %v3429_v15 = vsub.f32 %v1238_v55, %v3391_v8 }
  0x78   : > { %993 = vmatmul.f32.gmra.mxu3 %v3026_v13  ;;  %1084 = vmatpush.msra.mxu1 %v3018_v3  ;;  %v3282_v3 = vand.u32 4294901760, %v1245_v16  ;;  %v1328_v62 = vsub.f32 %v3250_v22, %v1327_v37  ;;  %v4068_v40 = vand.u32 4294901760, %v3293_v59  ;;  %v3382_v21 = vsub.f32 %v1241_v33, %v3352_v34 }
  0x79   : > { %1167 = vmatpush.msra.mxu2 %v968_v29  ;;  %1214 = vmatpush.msra.mxu3 %v3044_v9 }
  0x7a   : > { %1269 = vmatpush.msrb.mxu0 %v3230_v32  ;;  %1086 = vmatpush.msra.mxu1 %v3044_v9  ;;  %v1243_v9 = vld [vmem:[%s4026_s3 + $0x48] sm:$0xff]  ;;  %v3308_v19 = vsub.f32 %v1245_v16, %v3282_v3  ;;  %v1346_v17 = vsub.f32 %v3293_v59, %v4068_v40  ;;  %v4062_v12 = vand.u32 4294901760, %v3382_v21 }
  0x7b   : > { %1171 = vmatpush.msra.mxu2 %v974_v1  ;;  %1216 = vmatpush.msra.mxu3 %v3059_v57  ;;  %v3315_v29 = vand.u32 4294901760, %v1243_v9  ;;  %v1235_v16 = vld [vmem:[%s4026_s3 + $0x8] sm:$0xff] }
  0x7c   : > { %1271 = vmatpush.msrb.mxu0 %v3240_v2  ;;  %1088 = vmatpush.msra.mxu1 %v3059_v57  ;;  %v1339_v57 = vand.u32 4294901760, %v3275_v0  ;;  %v4067_v52 = vand.u32 4294901760, %v3308_v19  ;;  %v1347_v53 = vand.u32 4294901760, %v1346_v17  ;;  %v1376_v48 = vsub.f32 %v3382_v21, %v4062_v12 }
  0x7d   : > { %1175 = vmatpush.msra.mxu2 %v980_v39  ;;  %1218 = vmatpush.msra.mxu3 %v3084_v46  ;;  %v3342_v58 = vsub.f32 %v1243_v9, %v3315_v29  ;;  %v1240_v39 = vld [vmem:[%s4026_s3 + $0x30] sm:$0xff] }
  0x7e   : > { %1177 = vmatmul.f32.vlgmr.msra.gmra.mxu2 %v2868_v26  ;;  %1273 = vmatpush.msrb.mxu0 %v3247_v30  ;;  %v1340_v1 = vsub.f32 %v3275_v0, %v1339_v57  ;;  %v3364_v44 = vand.u32 4294901760, %v1240_v39  ;;  %v1377_v55 = vand.u32 4294901760, %v1376_v48 }
  0x7f   : > { %1436 = vmatpush.msrb.mxu2 %v3250_v22  ;;  %1090 = vmatpush.msra.mxu1 %v3084_v46  ;;  %v1329_v46 = vand.u32 4294901760, %v1328_v62  ;;  %v4064_v50 = vand.u32 4294901760, %v3342_v58  ;;  %v3442_v62 = vsub.f32 %v1237_v38, %v3406_v56 }
  0x80   : > { %1220 = vmatpush.msra.mxu3 %v3098_v18  ;;  %1047 = vmatmul.f32.vlgmr.msra.gmra.mxu0 %v2897_v43  ;;  %v3336_v43 = vand.u32 4294901760, %v1242_v10  ;;  %v1341_v49 = vand.u32 4294901760, %v1340_v1  ;;  %v3395_v31 = vsub.f32 %v1240_v39, %v3364_v44  ;;  %v1234_v1 = vld [vmem:[%s4026_s3] sm:$0xff]  ;;  %v4058_v39 = vand.u32 4294901760, %v3429_v15 }
  0x81   : > { %1222 = vmatmul.f32.vlgmr.msra.gmra.mxu3 %v2868_v26  ;;  %1275 = vmatpush.msrb.mxu0 %v3268_v6  ;;  %v1335_v26 = vand.u32 4294901760, %v1334_v4  ;;  %v1364_v42 = vsub.f32 %v3342_v58, %v4064_v50  ;;  %v1265_v4 = vld [vmem:[%s4026_s3 + $0xf8] sm:$0xff]  ;;  %v4057_v38 = vand.u32 4294901760, %v3442_v62 }
  0x82   : > { %1439 = vmatpush.msrb.mxu2 %v3261_v60  ;;  %1499 = vmatpush.msrb.mxu3 %v3230_v32  ;;  %v3367_v25 = vsub.f32 %v1242_v10, %v3336_v43  ;;  %v4061_v35 = vand.u32 4294901760, %v3395_v31  ;;  %v3448_v10 = vld [vmem:[%s3417_s5] sm:$0xff] }
  0x83   : > { %1092 = vmatpush.msra.mxu1 %v3098_v18  ;;  %1277 = vmatpush.msrb.mxu0 %v3282_v3  ;;  %v4065_v18 = vand.u32 4294901760, %v3324_v7  ;;  %4121 = vst [vmem:[#allocation4_spill] sm:$0xff] %v3448_v10 }
  0x84   : > { %1096 = vmatmul.f32.vlgmr.msra.gmra.mxu1 %v2931_v24  ;;  %1442 = vmatpush.msrb.mxu2 %v3275_v0  ;;  %v1352_v24 = vsub.f32 %v3308_v19, %v4067_v52  ;;  %v4063_v28 = vand.u32 4294901760, %v3367_v25 }
  0x85   : > { %1330 = vmatpush.msrb.mxu1 %v1329_v46  ;;  %1501 = vmatpush.msrb.mxu3 %v3240_v2  ;;  %v1358_v63 = vsub.f32 %v3324_v7, %v4065_v18  ;;  %v3452_v46 = vand.u32 4294901760, %v1235_v16 }
  0x86   : > { %1279 = vmatpush.msrb.mxu0 %v3290_v11  ;;  %1445 = vmatpush.msrb.mxu2 %v3293_v59  ;;  %v1353_v51 = vand.u32 4294901760, %v1352_v24  ;;  %v1370_v61 = vsub.f32 %v3367_v25, %v4063_v28  ;;  %v3473_v24 = vand.u32 4294901760, %v3448_v10 }
  0x87   : > { %1336 = vmatpush.msrb.mxu1 %v1335_v26  ;;  %1503 = vmatpush.msrb.mxu3 %v3247_v30  ;;  %v1359_v54 = vand.u32 4294901760, %v1358_v63  ;;  %v1382_v26 = vsub.f32 %v3395_v31, %v4061_v35  ;;  %v3480_v63 = vand.u32 4294901760, %v1234_v1 }
  0x88   : > { %1181 = vmatmul.f32.gmra.mxu2 %v2949_v23  ;;  %1281 = vmatpush.msrb.mxu0 %v3315_v29  ;;  %v1371_v33 = vand.u32 4294901760, %v1370_v61 }
  0x89   : > { %1342 = vmatpush.msrb.mxu1 %v1341_v49  ;;  %1448 = vmatpush.msrb.mxu2 %v3308_v19  ;;  %v3467_v49 = vand.u32 4294901760, %v1265_v4 }
  0x8a   : > { %1505 = vmatpush.msrb.mxu3 %v3268_v6  ;;  %1052 = vmatmul.f32.gmra.mxu0 %v2975_v36  ;;  %v1236_v36 = vld [vmem:[%s4026_s3 + $0x10] sm:$0xff] }
  0x8b   : > { %1226 = vmatmul.f32.gmra.mxu3 %v2949_v23  ;;  %1283 = vmatpush.msrb.mxu0 %v3336_v43  ;;  %v3410_v23 = vsub.f32 %v1239_v47, %v3379_v20  ;;  %v3425_v14 = vand.u32 4294901760, %v1236_v36  ;;  %v1264_v47 = vld [vmem:[%s4026_s3 + $0xf0] sm:$0xff]  ;;  %v3501_v61 = vsub.f32 %v1265_v4, %v3467_v49  ;;  %v3515_v4 = vsub.f32 %v1234_v1, %v3480_v63 }
  0x8c   : > { %1348 = vmatpush.msrb.mxu1 %v1347_v53  ;;  %1451 = vmatpush.msrb.mxu2 %v3324_v7 }
  0x8d   : > { %1507 = vmatpush.msrb.mxu3 %v3282_v3  ;;  %1102 = vmatmul.f32.gmra.mxu1 %v3007_v45  ;;  %v1365_v45 = vand.u32 4294901760, %v1364_v42  ;;  %v4059_v9 = vand.u32 4294901760, %v3410_v23  ;;  %v3464_v17 = vsub.f32 %v1236_v36, %v3425_v14  ;;  %v1383_v42 = vand.u32 4294901760, %v1382_v26 }
  0x8e   : > { %1285 = vmatpush.msrb.mxu0 %v3352_v34  ;;  %1354 = vmatpush.msrb.mxu1 %v1353_v51  ;;  %v3486_v51 = vsub.f32 %v1235_v16, %v3452_v46  ;;  %v1394_v36 = vsub.f32 %v3429_v15, %v4058_v39  ;;  %v3505_v16 = vsub.f32 %v3448_v10, %v3473_v24  ;;  %v1261_v39 = vld [vmem:[%s4026_s3 + $0xd8] sm:$0xff] }
  0x8f   : > { %1454 = vmatpush.msrb.mxu2 %v3342_v58  ;;  %1509 = vmatpush.msrb.mxu3 %v3290_v11  ;;  %v1388_v53 = vsub.f32 %v3410_v23, %v4059_v9  ;;  %v3535_v9 = vld [vmem:[%s3417_s5 + $0x10] sm:$0xff]  ;;  %v3551_v28 = vand.u32 4294901760, %v1261_v39 }
  0x90   : > { %1287 = vmatpush.msrb.mxu0 %v3364_v44  ;;  %1360 = vmatpush.msrb.mxu1 %v1359_v54  ;;  %v4060_v54 = vand.u32 4294901760, %v3464_v17  ;;  %v4066_v26 = vand.u32 4294901760, %v3486_v51  ;;  %4122 = vst [vmem:[#allocation5_spill] sm:$0xff] %v3535_v9 }
  0x91   : > { %1457 = vmatpush.msrb.mxu2 %v3367_v25  ;;  %1511 = vmatpush.msrb.mxu3 %v3315_v29  ;;  %v1389_v48 = vand.u32 4294901760, %v1388_v53 }
  0x92   : > { %1185 = vmatmul.f32.gmra.mxu2 %v3026_v13  ;;  %1289 = vmatpush.msrb.mxu0 %v3379_v20  ;;  %v1406_v53 = vsub.f32 %v3464_v17, %v4060_v54  ;;  %v4071_v54 = vand.u32 4294901760, %v3515_v4  ;;  %v1412_v12 = vsub.f32 %v3486_v51, %v4066_v26 }
  0x93   : > { %1366 = vmatpush.msrb.mxu1 %v1365_v45  ;;  %1460 = vmatpush.msrb.mxu2 %v3382_v21  ;;  %v1262_v45 = vld [vmem:[%s4026_s3 + $0xe0] sm:$0xff] }
  0x94   : > { %1513 = vmatpush.msrb.mxu3 %v3336_v43  ;;  %1057 = vmatmul.f32.gmra.mxu0 %v3057_v5  ;;  %v1263_v5 = vld [vmem:[%s4026_s3 + $0xe8] sm:$0xff]  ;;  %v3529_v1 = vand.u32 4294901760, %v1262_v45 }
  0x95   : > { %1230 = vmatmul.f32.gmra.mxu3 %v3026_v13  ;;  %1291 = vmatpush.msrb.mxu0 %v3391_v8  ;;  %v3496_v13 = vand.u32 4294901760, %v1264_v47 }
  0x96   : > { %1372 = vmatpush.msrb.mxu1 %v1371_v33  ;;  %1463 = vmatpush.msrb.mxu2 %v3395_v31  ;;  %v3517_v33 = vand.u32 4294901760, %v1263_v5  ;;  %v3562_v18 = vsub.f32 %v1262_v45, %v3529_v1  ;;  %v1418_v45 = vsub.f32 %v3515_v4, %v4071_v54 }
  0x97   : > { %1515 = vmatpush.msrb.mxu3 %v3352_v34  ;;  %1108 = vmatmul.f32.gmra.mxu1 %v3089_v41  ;;  %v1400_v41 = vsub.f32 %v3442_v62, %v4057_v38  ;;  %v3527_v38 = vsub.f32 %v1264_v47, %v3496_v13 }
  0x98   : > { %1293 = vmatpush.msrb.mxu0 %v3406_v56  ;;  %1378 = vmatpush.msrb.mxu1 %v1377_v55  ;;  %v1395_v55 = vand.u32 4294901760, %v1394_v36  ;;  %v4070_v36 = vand.u32 4294901760, %v3505_v16  ;;  %v3544_v35 = vsub.f32 %v1263_v5, %v3517_v33  ;;  %v1407_v5 = vand.u32 4294901760, %v1406_v53 }
  0x99   : > { %1466 = vmatpush.msrb.mxu2 %v3410_v23  ;;  %1517 = vmatpush.msrb.mxu3 %v3364_v44  ;;  %v1401_v47 = vand.u32 4294901760, %v1400_v41  ;;  %v3557_v41 = vand.u32 4294901760, %v3535_v9  ;;  %v4072_v50 = vand.u32 4294901760, %v3527_v38  ;;  %v1419_v60 = vand.u32 4294901760, %v1418_v45 }
  0x9a   : > { %1295 = vmatpush.msrb.mxu0 %v3425_v14  ;;  %1384 = vmatpush.msrb.mxu1 %v1383_v42  ;;  %v4069_v42 = vand.u32 4294901760, %v3501_v61  ;;  %v1303_v52 = vsub.f32 %v3505_v16, %v4070_v36  ;;  %v3586_v36 = vsub.f32 %v1261_v39, %v3551_v28  ;;  %v4127_v45 = vand.u32 4294901760, %v3293_v59 }
  0x9b   : > { %1469 = vmatpush.msrb.mxu2 %v3429_v15  ;;  %1519 = vmatpush.msrb.mxu3 %v3379_v20  ;;  %v3590_v22 = vsub.f32 %v3535_v9, %v3557_v41 }
  0x9c   : > { %1297 = vmatpush.msrb.mxu0 %v3452_v46  ;;  %1390 = vmatpush.msrb.mxu1 %v1389_v48  ;;  %v1260_v48 = vld [vmem:[%s4026_s3 + $0xd0] sm:$0xff]  ;;  %v1731_v26 = vsub.f32 %v3501_v61, %v4069_v42  ;;  %v1413_v42 = vand.u32 4294901760, %v1412_v12  ;;  %v1737_v12 = vsub.f32 %v3527_v38, %v4072_v50  ;;  %v1304_v53 = vand.u32 4294901760, %v1303_v52  ;;  %v3620_v52 = vld [vmem:[%s3417_s5 + $0x20] sm:$0xff] }
  0x9d   : > { %1472 = vmatpush.msrb.mxu2 %v3442_v62  ;;  %1521 = vmatpush.msrb.mxu3 %v3391_v8  ;;  %v3581_v40 = vand.u32 4294901760, %v1260_v48  ;;  %4126 = vst [vmem:[#allocation8_spill] sm:$0xff] %v3620_v52  ;;  %v4075_v0 = vand.u32 4294901760, %v3586_v36  ;;  %v3640_v59 = vand.u32 4294901760, %v3620_v52 }
  0x9e   : > { %1299 = vmatpush.msrb.mxu0 %v3480_v63  ;;  %1396 = vmatpush.msrb.mxu1 %v1395_v55  ;;  %v1259_v55 = vld [vmem:[%s4026_s3 + $0xc8] sm:$0xff]  ;;  %v1732_v54 = vand.u32 4294901760, %v1731_v26  ;;  %v1257_v26 = vld [vmem:[%s4026_s3 + $0xb8] sm:$0xff] }
  0x9f   : > { %1475 = vmatpush.msrb.mxu2 %v3464_v17  ;;  %1523 = vmatpush.msrb.mxu3 %v3406_v56  ;;  %v3612_v50 = vsub.f32 %v1260_v48, %v3581_v40  ;;  %v1738_v48 = vand.u32 4294901760, %v1737_v12  ;;  %v4129_v12 = vand.u32 4294901760, %v3308_v19  ;;  %v1255_v19 = vld [vmem:[%s4026_s3 + $0xa8] sm:$0xff] }
  0xa0   : > { %1552 = vmatpush.msra.mxu0 %v1327_v37  ;;  %1402 = vmatpush.msrb.mxu1 %v1401_v47  ;;  %v1258_v37 = vld [vmem:[%s4026_s3 + $0xc0] sm:$0xff]  ;;  %v3601_v47 = vand.u32 4294901760, %v1259_v55 }
  0xa1   : > { %1478 = vmatpush.msrb.mxu2 %v3486_v51  ;;  %1525 = vmatpush.msrb.mxu3 %v3425_v14  ;;  %v3614_v39 = vand.u32 4294901760, %v1258_v37 }
  0xa2   : > { %1556 = vmatpush.msra.mxu0 %v1333_v27  ;;  %1408 = vmatpush.msrb.mxu1 %v1407_v5  ;;  %4123 = vst [vmem:[#allocation6_spill] sm:$0xff] %v3601_v47  ;;  %v4124_v27 = vand.u32 4294901760, %v3544_v35  ;;  %v3632_v10 = vsub.f32 %v1259_v55, %v3601_v47 }
  0xa3   : > { %1481 = vmatpush.msrb.mxu2 %v3515_v4  ;;  %1527 = vmatpush.msrb.mxu3 %v3452_v46  ;;  %4125 = vst [vmem:[#allocation7_spill] sm:$0xff] %v3614_v39  ;;  %v3646_v55 = vsub.f32 %v1258_v37, %v3614_v39  ;;  %v4131_v37 = vand.u32 4294901760, %v3324_v7  ;;  %v1254_v7 = vld [vmem:[%s4026_s3 + $0xa0] sm:$0xff] }
  0xa4   : > { %1560 = vmatpush.msra.mxu0 %v1339_v57  ;;  %v1743_v5 = vsub.f32 %v3544_v35, %v4124_v27  ;;  %1414 = vmatpush.msrb.mxu1 %v1413_v42  ;;  %v4128_v27 = vand.u32 4294901760, %v3562_v18  ;;  %v3634_v42 = vand.u32 4294901760, %v1257_v26  ;;  %v1256_v57 = vld [vmem:[%s4026_s3 + $0xb0] sm:$0xff] }
  0xa5   : > { %1672 = vmatpush.msra.mxu2 %v3467_v49  ;;  %1529 = vmatpush.msrb.mxu3 %v3480_v63 }
  0xa6   : > { %1564 = vmatpush.msra.mxu0 %v4127_v45  ;;  %v1749_v9 = vsub.f32 %v3562_v18, %v4128_v27  ;;  %1420 = vmatpush.msrb.mxu1 %v1419_v60  ;;  %v1744_v45 = vand.u32 4294901760, %v1743_v5  ;;  %v4077_v27 = vand.u32 4294901760, %v3612_v50 }
  0xa7   : > { %1674 = vmatpush.msra.mxu2 %v3496_v13  ;;  %1733 = vmatpush.msra.mxu3 %v1732_v54  ;;  %v1755_v54 = vsub.f32 %v3586_v36, %v4075_v0  ;;  %v3667_v0 = vsub.f32 %v1257_v26, %v3634_v42  ;;  %v4132_v26 = vand.u32 4294901760, %v3342_v58  ;;  %v1253_v58 = vld [vmem:[%s4026_s3 + $0x98] sm:$0xff] }
  0xa8   : > { %1305 = vmatmul.f32.vlgmr.msrb.gmra.mxu0 %v1304_v53  ;;  %1627 = vmatpush.msra.mxu1 %v3230_v32  ;;  %v4130_v53 = vand.u32 4294901760, %v3590_v22  ;;  %v1750_v5 = vand.u32 4294901760, %v1749_v9  ;;  %v3693_v9 = vand.u32 4294901760, %v1254_v7 }
  0xa9   : > { %1568 = vmatpush.msra.mxu0 %v4129_v12  ;;  %1676 = vmatpush.msra.mxu2 %v3517_v33  ;;  %v3662_v12 = vand.u32 4294901760, %v1256_v57 }
  0xaa   : > { %v1311_v60 = vsub.f32 %v3590_v22, %v4130_v53  ;;  %1739 = vmatpush.msra.mxu3 %v1738_v48  ;;  %1629 = vmatpush.msra.mxu1 %v3240_v2  ;;  %v3671_v53 = vsub.f32 %v3620_v52, %v3640_v59  ;;  %v1761_v2 = vsub.f32 %v3612_v50, %v4077_v27  ;;  %v3681_v48 = vand.u32 4294901760, %v1255_v19 }
  0xab   : > { %1572 = vmatpush.msra.mxu0 %v4131_v37  ;;  %1678 = vmatpush.msra.mxu2 %v3529_v1  ;;  %v1756_v37 = vand.u32 4294901760, %v1755_v54  ;;  %v3691_v27 = vsub.f32 %v1256_v57, %v3662_v12  ;;  %v4135_v54 = vand.u32 4294901760, %v3367_v25  ;;  %v3712_v25 = vand.u32 4294901760, %v1253_v58 }
  0xac   : > { %1745 = vmatpush.msra.mxu3 %v1744_v45  ;;  %1484 = vmatmul.f32.vlgmr.msrb.gmra.mxu2 %v3505_v16  ;;  %v1312_v32 = vand.u32 4294901760, %v1311_v60  ;;  %v4133_v45 = vand.u32 4294901760, %v3632_v10  ;;  %v4078_v60 = vand.u32 4294901760, %v3667_v0  ;;  %v1762_v57 = vand.u32 4294901760, %v1761_v2 }
  0xad   : > { %1576 = vmatpush.msra.mxu0 %v4132_v26  ;;  %1631 = vmatpush.msra.mxu1 %v3247_v30  ;;  %v4134_v30 = vand.u32 4294901760, %v3505_v16  ;;  %v4136_v26 = vand.u32 4294901760, %v3646_v55  ;;  %v3710_v16 = vsub.f32 %v1255_v19, %v3681_v48 }
  0xae   : > { %1680 = vmatpush.msra.mxu2 %v3551_v28  ;;  %1751 = vmatpush.msra.mxu3 %v1750_v5  ;;  %v1767_v52 = vsub.f32 %v3632_v10, %v4133_v45  ;;  %v4079_v5 = vand.u32 4294901760, %v3671_v53  ;;  %v1779_v19 = vsub.f32 %v3667_v0, %v4078_v60  ;;  %v3746_v60 = vsub.f32 %v1253_v58, %v3712_v25 }
  0xaf   : > { %1533 = vmatmul.f32.vlgmr.msrb.gmra.mxu3 %v4134_v30  ;;  %1580 = vmatpush.msra.mxu0 %v4135_v54  ;;  %v1773_v45 = vsub.f32 %v3646_v55, %v4136_v26  ;;  %v1252_v30 = vld [vmem:[%s4026_s3 + $0x90] sm:$0xff]  ;;  %v4080_v54 = vand.u32 4294901760, %v3691_v27  ;;  %v3722_v26 = vsub.f32 %v1254_v7, %v3693_v9  ;;  %v4138_v7 = vand.u32 4294901760, %v3395_v31 }
  0xb0   : > { %1633 = vmatpush.msra.mxu1 %v3268_v6  ;;  %1682 = vmatpush.msra.mxu2 %v3581_v40  ;;  %v4137_v6 = vand.u32 4294901760, %v3382_v21  ;;  %v1768_v2 = vand.u32 4294901760, %v1767_v52  ;;  %v1251_v21 = vld [vmem:[%s4026_s3 + $0x88] sm:$0xff]  ;;  %v4139_v58 = vand.u32 4294901760, %v3410_v23  ;;  %v4141_v23 = vand.u32 4294901760, %v3429_v15 }
  0xb1   : > { %1757 = vmatpush.msra.mxu3 %v1756_v37  ;;  %1313 = vmatmul.f32.gmra.mxu0 %v1312_v32  ;;  %v1319_v32 = vsub.f32 %v3671_v53, %v4079_v5  ;;  %v3736_v52 = vld [vmem:[%s3417_s5 + $0x8] sm:$0xff]  ;;  %v1790_v37 = vand.u32 4294901760, %v3710_v16  ;;  %v1250_v5 = vld [vmem:[%s4026_s3 + $0x80] sm:$0xff]  ;;  %v1785_v31 = vsub.f32 %v3691_v27, %v4080_v54 }
  0xb2   : > { %1422 = vmatmul.f32.vlgmr.msrb.gmra.mxu1 %v3473_v24  ;;  %1584 = vmatpush.msra.mxu0 %v4137_v6  ;;  %v3741_v6 = vand.u32 4294901760, %v1252_v30 }
  0xb3   : > { %1635 = vmatpush.msra.mxu1 %v3282_v3  ;;  %1684 = vmatpush.msra.mxu2 %v3601_v47  ;;  %v1774_v3 = vand.u32 4294901760, %v1773_v45  ;;  %v3756_v45 = vand.u32 4294901760, %v1251_v21  ;;  %v1791_v54 = vsub.f32 %v3710_v16, %v1790_v37  ;;  %v4140_v47 = vand.u32 4294901760, %v3590_v22 }
  0xb4   : > { %1763 = vmatpush.msra.mxu3 %v1762_v57  ;;  %1588 = vmatpush.msra.mxu0 %v4138_v7  ;;  %v1780_v7 = vand.u32 4294901760, %v1779_v19  ;;  %v3769_v57 = vsub.f32 %v1252_v30, %v3741_v6  ;;  %v4142_v30 = vand.u32 4294901760, %v3722_v26 }
  0xb5   : > { %1637 = vmatpush.msra.mxu1 %v3290_v11  ;;  %1686 = vmatpush.msra.mxu2 %v3614_v39  ;;  %v3759_v11 = vand.u32 4294901760, %v3736_v52  ;;  %v3771_v39 = vand.u32 4294901760, %v1250_v5 }
  0xb6   : > { %1769 = vmatpush.msra.mxu3 %v1768_v2  ;;  %1489 = vmatmul.f32.gmra.mxu2 %v3590_v22  ;;  %v1320_v2 = vand.u32 4294901760, %v1319_v32  ;;  %v3778_v19 = vpop.f32.mrf.mxu0  ;;  %v1786_v32 = vand.u32 4294901760, %v1785_v31  ;;  %v3786_v22 = vsub.f32 %v1251_v21, %v3756_v45  ;;  %v1808_v31 = vand.u32 4294901760, %v3769_v57 }
  0xb7   : > { %1592 = vmatpush.msra.mxu0 %v4139_v58  ;;  %1639 = vmatpush.msra.mxu1 %v3315_v29  ;;  %v1802_v29 = vand.u32 4294901760, %v3746_v60  ;;  %v3790_v15 = vsub.f32 %v3736_v52, %v3759_v11  ;;  %v3797_v58 = vsub.f32 %v1250_v5, %v3771_v39 }
  0xb8   : > { %1688 = vmatpush.msra.mxu2 %v3634_v42  ;;  %1775 = vmatpush.msra.mxu3 %v1774_v3  ;;  %v1797_v3 = vsub.f32 %v3722_v26, %v4142_v30  ;;  %v1814_v5 = vand.u32 4294901760, %v3786_v22  ;;  %v4145_v30 = vand.u32 4294901760, %v3486_v51  ;;  %v4147_v51 = vand.u32 4294901760, %v3515_v4 }
  0xb9   : > { %1539 = vmatmul.f32.gmra.mxu3 %v4140_v47  ;;  %1596 = vmatpush.msra.mxu0 %v4141_v23  ;;  %v1792_v47 = vand.u32 4294901760, %v1791_v54  ;;  %v1803_v21 = vsub.f32 %v3746_v60, %v1802_v29  ;;  %v3845_v4 = vstv %s426_s10 }
  0xba   : > { %1641 = vmatpush.msra.mxu1 %v3336_v43  ;;  %1690 = vmatpush.msra.mxu2 %v3662_v12  ;;  %v4143_v43 = vand.u32 4294901760, %v3442_v62  ;;  %v583_v23 = vpop.f32.mrf.mxu1  ;;  %v4144_v62 = vand.u32 4294901760, %v3464_v17  ;;  %v1798_v54 = vand.u32 4294901760, %v1797_v3  ;;  %v1815_v3 = vsub.f32 %v3786_v22, %v1814_v5 }
  0xbb   : > { %1781 = vmatpush.msra.mxu3 %v1780_v7  ;;  %1321 = vmatmul.f32.gmra.mxu0 %v1320_v2  ;;  %v3805_v7 = vld [vmem:[%s3417_s5 + $0x18] sm:$0xff]  ;;  %v4085_v2 = vand.u32 4294901760, %v3790_v15 }
  0xbc   : > { %1426 = vmatmul.f32.gmra.mxu1 %v3557_v41  ;;  %1600 = vmatpush.msra.mxu0 %v4143_v43  ;;  %v3819_v17 = vand.u32 4294901760, %v3805_v7 }
  0xbd   : > { %1643 = vmatpush.msra.mxu1 %v3352_v34  ;;  %1692 = vmatpush.msra.mxu2 %v3681_v48  ;;  %v1809_v34 = vsub.f32 %v3769_v57, %v1808_v31  ;;  %v1706_v43 = vsub.f32 %v3790_v15, %v4085_v2  ;;  %v467_v2 = vadd.f32 %v3778_v19, %v3845_v4 }
  0xbe   : > { %1787 = vmatpush.msra.mxu3 %v1786_v32  ;;  %1604 = vmatpush.msra.mxu0 %v4144_v62  ;;  %v1820_v32 = vand.u32 4294901760, %v3797_v58 }
  0xbf   : > { %1645 = vmatpush.msra.mxu1 %v3364_v44  ;;  %1694 = vmatpush.msra.mxu2 %v3693_v9  ;;  %v1804_v44 = vand.u32 4294901760, %v1803_v21 }
  0xc0   : > { %1793 = vmatpush.msra.mxu3 %v1792_v47  ;;  %1494 = vmatmul.f32.gmra.mxu2 %v3671_v53  ;;  %v4146_v47 = vand.u32 4294901760, %v3671_v53  ;;  %v1821_v21 = vsub.f32 %v3797_v58, %v1820_v32  ;;  %v1707_v53 = vand.u32 4294901760, %v1706_v43  ;;  %v584_v43 = vadd.f32 %v583_v23, %v467_v2 }
  0xc1   : > { %1608 = vmatpush.msra.mxu0 %v4145_v30  ;;  %1647 = vmatpush.msra.mxu1 %v3379_v20  ;;  %v1810_v20 = vand.u32 4294901760, %v1809_v34 }
  0xc2   : > { %1696 = vmatpush.msra.mxu2 %v3712_v25  ;;  %1799 = vmatpush.msra.mxu3 %v1798_v54  ;;  %v3842_v54 = vsub.f32 %v3805_v7, %v3819_v17 }
  0xc3   : > { %1545 = vmatmul.f32.gmra.mxu3 %v4146_v47  ;;  %1612 = vmatpush.msra.mxu0 %v4147_v51  ;;  %v474_v62 = vpop.f32.mrf.mxu0  ;;  %v3852_v47 = vld [vmem:[%s3417_s5 + $0x28] sm:$0xff] }
  0xc4   : > { %1649 = vmatpush.msra.mxu1 %v3391_v8  ;;  %1698 = vmatpush.msra.mxu2 %v3741_v6  ;;  %v1816_v8 = vand.u32 4294901760, %v1815_v3  ;;  %v645_v30 = vpop.f32.mrf.mxu2  ;;  %v1713_v51 = vand.u32 4294901760, %v3842_v54  ;;  %v3861_v3 = vand.u32 4294901760, %v3852_v47 }
  0xc5   : > { %1805 = vmatpush.msra.mxu3 %v1804_v44  ;;  %1430 = vmatmul.f32.gmra.mxu1 %v3640_v59  ;;  %v587_v34 = vpop.f32.mrf.mxu1  ;;  %v1822_v44 = vand.u32 4294901760, %v1821_v21  ;;  %v4149_v21 = vand.u32 4294901760, %v3527_v38  ;;  %v646_v23 = vadd.f32 %v645_v30, %v584_v43 }
  0xc6   : > { %1614 = vmatmul.f32.vlgmr.msra.gmra.mxu0 %v3473_v24  ;;  %1651 = vmatpush.msra.mxu1 %v3406_v56  ;;  %v694_v56 = vpop.f32.mrf.mxu3  ;;  %v1714_v19 = vsub.f32 %v3842_v54, %v1713_v51 }
  0xc7   : > { %1839 = vmatpush.msrb.mxu0 %v3501_v61  ;;  %1700 = vmatpush.msra.mxu2 %v3756_v45 }
  0xc8   : > { %1811 = vmatpush.msra.mxu3 %v1810_v20  ;;  %1653 = vmatpush.msra.mxu1 %v3425_v14  ;;  %v4148_v14 = vand.u32 4294901760, %v3501_v61  ;;  %v3877_v61 = vsub.f32 %v3852_v47, %v3861_v3 }
  0xc9   : > { %1842 = vmatpush.msrb.mxu0 %v3527_v38  ;;  %1702 = vmatpush.msra.mxu2 %v3771_v39  ;;  %v4150_v38 = vand.u32 4294901760, %v3544_v35 }
  0xca   : > { %1817 = vmatpush.msra.mxu3 %v1816_v8  ;;  %1708 = vmatmul.f32.vlgmr.msra.gmra.mxu2 %v1707_v53  ;;  %v475_v53 = vadd.f32 %v474_v62, %v3845_v4  ;;  %v4152_v62 = vand.u32 4294901760, %v3586_v36 }
  0xcb   : > { %1845 = vmatpush.msrb.mxu0 %v3544_v35  ;;  %1955 = vmatpush.msrb.mxu2 %v4148_v14 }
  0xcc   : > { %1655 = vmatpush.msra.mxu1 %v3452_v46  ;;  %1823 = vmatpush.msra.mxu3 %v1822_v44  ;;  %v1715_v46 = vand.u32 4294901760, %v1714_v19  ;;  %v588_v35 = vadd.f32 %v587_v34, %v475_v53  ;;  %v4153_v44 = vand.u32 4294901760, %v3612_v50 }
  0xcd   : > { %1825 = vmatmul.f32.vlgmr.msra.gmra.mxu3 %v3759_v11  ;;  %1848 = vmatpush.msrb.mxu0 %v3562_v18  ;;  %v482_v20 = vpop.f32.mrf.mxu0 }
  0xce   : > { %1959 = vmatpush.msrb.mxu2 %v4149_v21  ;;  %2030 = vmatpush.msrb.mxu3 %v3467_v49  ;;  %v650_v8 = vpop.f32.mrf.mxu2 }
  0xcf   : > { %1657 = vmatpush.msra.mxu1 %v3480_v63  ;;  %1618 = vmatmul.f32.gmra.mxu0 %v3557_v41  ;;  %v591_v2 = vpop.f32.mrf.mxu1  ;;  %v1721_v63 = vand.u32 4294901760, %v3877_v61 }
  0xd0   : > { %1659 = vmatmul.f32.vlgmr.msra.gmra.mxu1 %v3473_v24  ;;  %1851 = vmatpush.msrb.mxu0 %v3586_v36  ;;  %v4151_v24 = vand.u32 4294901760, %v3562_v18  ;;  %v651_v36 = vadd.f32 %v650_v8, %v588_v35  ;;  %v4159_v8 = vand.u32 4294901760, %v3691_v27 }
  0xd1   : > { %1902 = vmatpush.msrb.mxu1 %v3467_v49  ;;  %1963 = vmatpush.msrb.mxu2 %v4150_v38  ;;  %v700_v30 = vpop.f32.mrf.mxu3  ;;  %v695_v49 = vadd.f32 %v694_v56, %v646_v23  ;;  %v1722_v18 = vsub.f32 %v3877_v61, %v1721_v63  ;;  %v4156_v23 = vld [vmem:[#allocation6_spill] sm:$0xff] }
  0xd2   : > { %2032 = vmatpush.msrb.mxu3 %v3496_v13  ;;  %1854 = vmatpush.msrb.mxu0 %v3612_v50  ;;  %v483_v50 = vadd.f32 %v482_v20, %v3845_v4  ;;  %v701_v43 = vadd.f32 %v700_v30, %v651_v36  ;;  %v4158_v20 = vld [vmem:[#allocation7_spill] sm:$0xff]  ;;  %v4160_v30 = vand.u32 4294901760, %v3722_v26 }
  0xd3   : > { %1904 = vmatpush.msrb.mxu1 %v3496_v13  ;;  %1967 = vmatpush.msrb.mxu2 %v4151_v24  ;;  %v1723_v34 = vand.u32 4294901760, %v1722_v18 }
  0xd4   : > { %2034 = vmatpush.msrb.mxu3 %v3517_v33  ;;  %1716 = vmatmul.f32.gmra.mxu2 %v1715_v46 }
  0xd5   : > { %1857 = vmatpush.msrb.mxu0 %v3632_v10  ;;  %1906 = vmatpush.msrb.mxu1 %v3517_v33 }
  0xd6   : > { %1971 = vmatpush.msrb.mxu2 %v4152_v62  ;;  %2036 = vmatpush.msrb.mxu3 %v3529_v1 }
  0xd7   : > { %1829 = vmatmul.f32.gmra.mxu3 %v3819_v17  ;;  %1860 = vmatpush.msrb.mxu0 %v3646_v55  ;;  %v775_v13 = vpop.f32.mrf.mxu0 }
  0xd8   : > { %1908 = vmatpush.msrb.mxu1 %v3529_v1  ;;  %1975 = vmatpush.msrb.mxu2 %v4153_v44  ;;  %v776_v33 = vadd.f32 %v775_v13, %v695_v49  ;;  %v655_v14 = vpop.f32.mrf.mxu2  ;;  %v4154_v1 = vand.u32 4294901760, %v3632_v10  ;;  %v4157_v10 = vand.u32 4294901760, %v3667_v0  ;;  %v4162_v44 = vld [vmem:[#allocation4_spill] sm:$0xff] }
  0xd9   : > { %2038 = vmatpush.msrb.mxu3 %v3551_v28  ;;  %1622 = vmatmul.f32.gmra.mxu0 %v3640_v59 }
  0xda   : > { %1663 = vmatmul.f32.gmra.mxu1 %v3557_v41  ;;  %1863 = vmatpush.msrb.mxu0 %v3667_v0  ;;  %v820_v56 = vpop.f32.mrf.mxu1  ;;  %v4155_v41 = vand.u32 4294901760, %v3646_v55 }
  0xdb   : > { %1910 = vmatpush.msrb.mxu1 %v3551_v28  ;;  %1979 = vmatpush.msrb.mxu2 %v4154_v1  ;;  %v821_v19 = vadd.f32 %v820_v56, %v776_v33  ;;  %v706_v46 = vpop.f32.mrf.mxu3  ;;  %v592_v28 = vadd.f32 %v591_v2, %v483_v50 }
  0xdc   : > { %2040 = vmatpush.msrb.mxu3 %v3581_v40  ;;  %1866 = vmatpush.msrb.mxu0 %v3691_v27 }
  0xdd   : > { %1912 = vmatpush.msrb.mxu1 %v3581_v40  ;;  %1983 = vmatpush.msrb.mxu2 %v4155_v41  ;;  %v2439_v21 = vmul.f32 -1.442695, %v821_v19  ;;  %v656_v2 = vadd.f32 %v655_v14, %v592_v28 }
  0xde   : > { %2042 = vmatpush.msrb.mxu3 %v4156_v23  ;;  %1724 = vmatmul.f32.gmra.mxu2 %v1723_v34 }
  0xdf   : > { %1869 = vmatpush.msrb.mxu0 %v3710_v16  ;;  %1914 = vmatpush.msrb.mxu1 %v4156_v23  ;;  %2473 = vpow2.f32 %v2439_v21 }
  0xe0   : > { %1987 = vmatpush.msrb.mxu2 %v4157_v10  ;;  %2044 = vmatpush.msrb.mxu3 %v4158_v20  ;;  %v779_v40 = vpop.f32.mrf.mxu0 }
  0xe1   : > { %1833 = vmatmul.f32.gmra.mxu3 %v3861_v3  ;;  %1872 = vmatpush.msrb.mxu0 %v3722_v26  ;;  %v780_v55 = vadd.f32 %v779_v40, %v701_v43 }
  0xe2   : > { %1916 = vmatpush.msrb.mxu1 %v4158_v20  ;;  %1991 = vmatpush.msrb.mxu2 %v4159_v8 }
  0xe3   : > { %2046 = vmatpush.msrb.mxu3 %v3634_v42  ;;  %1667 = vmatmul.f32.gmra.mxu1 %v3640_v59  ;;  %v824_v0 = vpop.f32.mrf.mxu1 }
  0xe4   : > { %1875 = vmatpush.msrb.mxu0 %v3746_v60  ;;  %1918 = vmatpush.msrb.mxu1 %v3634_v42  ;;  %v825_v38 = vadd.f32 %v824_v0, %v780_v55  ;;  %v869_v53 = vpop.f32.mrf.mxu2  ;;  %v707_v42 = vadd.f32 %v706_v46, %v656_v2  ;;  %v4163_v55 = vld [vmem:[#allocation5_spill] sm:$0xff] }
  0xe5   : > { %v2474_v24 = vpop.eup %2473  ;;  %1995 = vmatpush.msrb.mxu2 %v1790_v37  ;;  %2048 = vmatpush.msrb.mxu3 %v3662_v12 }
  0xe6   : > { %1878 = vmatpush.msrb.mxu0 %v3769_v57  ;;  %1920 = vmatpush.msrb.mxu1 %v3662_v12  ;;  %v2149_v27 = vadd.f32 1.0, %v2474_v24  ;;  %v2441_v59 = vmul.f32 -1.442695, %v825_v38 }
  0xe7   : > { %1999 = vmatpush.msrb.mxu2 %v4160_v30  ;;  %2050 = vmatpush.msrb.mxu3 %v3681_v48  ;;  %v986_v49 = vpop.f32.mrf.mxu3 }
  0xe8   : > { %1881 = vmatpush.msrb.mxu0 %v3786_v22  ;;  %1922 = vmatpush.msrb.mxu1 %v3681_v48  ;;  %2475 = vrcp.f32 %v2149_v27  ;;  %vm2160_vm0 = vweird.f32 %v2149_v27 }
  0xe9   : > { %2003 = vmatpush.msrb.mxu2 %v1802_v29  ;;  %2052 = vmatpush.msrb.mxu3 %v3693_v9  ;;  %2477 = vpow2.f32 %v2441_v59 }
  0xea   : > { %1884 = vmatpush.msrb.mxu0 %v3797_v58  ;;  %1924 = vmatpush.msrb.mxu1 %v3693_v9  ;;  %v783_v12 = vpop.f32.mrf.mxu0  ;;  %v4161_v58 = vand.u32 4294901760, %v3790_v15 }
  0xeb   : > { %2007 = vmatpush.msrb.mxu2 %v1808_v31  ;;  %2054 = vmatpush.msrb.mxu3 %v3712_v25  ;;  %v784_v16 = vadd.f32 %v783_v12, %v707_v42 }
  0xec   : > { %1887 = vmatmul.f32.vlgmr.msrb.gmra.mxu0 %v3790_v15  ;;  %1926 = vmatpush.msrb.mxu1 %v3712_v25 }
  0xed   : > { %2011 = vmatpush.msrb.mxu2 %v1814_v5  ;;  %2056 = vmatpush.msrb.mxu3 %v3741_v6  ;;  %v828_v48 = vpop.f32.mrf.mxu1 }
  0xee   : > { %v2476_v60 = vpop.eup %2475  ;;  %1928 = vmatpush.msrb.mxu1 %v3741_v6  ;;  %v829_v9 = vadd.f32 %v828_v48, %v784_v16  ;;  %v877_v26 = vpop.f32.mrf.mxu2  ;;  %v2166_v6 = vand.u32 2147483648, %v2149_v27 }
  0xef   : > { %v2478_v37 = vpop.eup %2477  ;;  %2015 = vmatpush.msrb.mxu2 %v1820_v32  ;;  %2058 = vmatpush.msrb.mxu3 %v3756_v45  ;;  %v2156_v57 = vmul.f32 %v2476_v60, %v2149_v27  ;;  %vm2161_vm1 = vweird.f32 %v2476_v60 }
  0xf0   : > { %2017 = vmatmul.f32.vlgmr.msrb.gmra.mxu2 %v3759_v11  ;;  %1930 = vmatpush.msrb.mxu1 %v3756_v45  ;;  %v2151_v25 = vadd.f32 1.0, %v2478_v37  ;;  %v2443_v29 = vmul.f32 -1.442695, %v829_v9  ;;  %v2164_v45 = vand.u32 2147483647, %v2149_v27  ;;  %vm2162_vm2 = vmor %vm2160_vm0, %vm2161_vm1  ;;  %v2167_v35 = vor.u32 1.1754944e-38, %v2166_v6 }
  0xf1   : > { %2060 = vmatpush.msrb.mxu3 %v3771_v39  ;;  %v2157_v22 = vsub.f32 1.0, %v2156_v57  ;;  %v990_v31 = vpop.f32.mrf.mxu3  ;;  %v4164_v57 = vld [vmem:[#allocation8_spill] sm:$0xff] }
  0xf2   : > { %2062 = vmatmul.f32.vlgmr.msrb.gmra.mxu3 %v3759_v11  ;;  %1932 = vmatpush.msrb.mxu1 %v3771_v39  ;;  %2479 = vrcp.f32 %v2151_v25  ;;  %v870_v11 = vadd.f32 %v869_v53, %v3845_v4  ;;  %vm2165_vm3 = vcmp.eq.f32.partialorder %v2164_v45, 8.507059e+37  ;;  %v2196_v34 = vand.u32 2147483648, %v2151_v25 }
  0xf3   : > { %1936 = vmatmul.f32.vlgmr.msrb.gmra.mxu1 %v4161_v58  ;;  %v2158_v5 = vmul.f32 %v2476_v60, %v2157_v22  ;;  %2481 = vpow2.f32 %v2443_v29  ;;  %vm2190_vm4 = vweird.f32 %v2151_v25  ;;  %v2194_v50 = vand.u32 2147483647, %v2151_v25 }
  0xf4   : > { %1892 = vmatmul.f32.gmra.mxu0 %v3842_v54  ;;  %v987_v56 = vadd.f32 %v986_v49, %v870_v11  ;;  %v2197_v21 = vor.u32 1.1754944e-38, %v2196_v34  ;;  %v878_v54 = vadd.f32 %v877_v26, %v3845_v4 }
  0xf5   : > { %v2159_v32 = vadd.f32 %v2476_v60, %v2158_v5  ;;  %vm2195_vm7 = vcmp.eq.f32.partialorder %v2194_v50, 8.507059e+37 }
  0xf6   : > { %v991_v38 = vadd.f32 %v990_v31, %v878_v54 }
  0xf7   : > { %v2163_v62 = vsel %vm2162_vm2, %v2476_v60, %v2159_v32 }
  0xf8   : > { %v2480_v39 = vpop.eup %2479  ;;  %v2168_v15 = vsel %vm2165_vm3, %v2167_v35, %v2163_v62  ;;  %2021 = vmatmul.f32.gmra.mxu2 %v3819_v17  ;;  %v885_v18 = vpop.f32.mrf.mxu2 }
  0xf9   : > { %v2482_v13 = vpop.eup %2481  ;;  %v2251_v33 = vmul.f32 %v2168_v15, %v4162_v44  ;;  %v2186_v36 = vmul.f32 %v2480_v39, %v2151_v25  ;;  %vm2191_vm5 = vweird.f32 %v2480_v39 }
  0xfa   : > { %2066 = vmatmul.f32.gmra.mxu3 %v3819_v17  ;;  %v2153_v14 = vadd.f32 1.0, %v2482_v13  ;;  %vm2192_vm6 = vmor %vm2190_vm4, %vm2191_vm5 }
  0xfb   : > { %2257 = vst [vmem:[%s3976_s12] sm:$0xff] %v2251_v33  ;;  %1942 = vmatmul.f32.gmra.mxu1 %v1713_v51  ;;  %v2187_v1 = vsub.f32 1.0, %v2186_v36  ;;  %v994_v19 = vpop.f32.mrf.mxu3 }
  0xfc   : > { %1897 = vmatmul.f32.gmra.mxu0 %v3877_v61  ;;  %2483 = vrcp.f32 %v2153_v14  ;;  %v2226_v0 = vand.u32 2147483648, %v2153_v14  ;;  %vm2220_vm8 = vweird.f32 %v2153_v14  ;;  %v2224_v59 = vand.u32 2147483647, %v2153_v14 }
  0xfd   : > { %v2188_v41 = vmul.f32 %v2480_v39, %v2187_v1  ;;  %v1048_v43 = vpop.f32.mrf.mxu0 }
  0xfe   : > { %v1049_v17 = vadd.f32 %v1048_v43, %v987_v56  ;;  %vm2225_vm11 = vcmp.eq.f32.partialorder %v2224_v59, 8.507059e+37 }
  0xff   : > { %v2189_v46 = vadd.f32 %v2480_v39, %v2188_v41 }
 0x100   : > { %2025 = vmatmul.f32.gmra.mxu2 %v3861_v3 }
 0x101   : > { %v2193_v51 = vsel %vm2192_vm6, %v2480_v39, %v2189_v46  ;;  %v1097_v23 = vpop.f32.mrf.mxu1  ;;  %v1178_v28 = vpop.f32.mrf.mxu2 }
 0x102   : > { %v2484_v10 = vpop.eup %2483  ;;  %v2198_v20 = vsel %vm2195_vm7, %v2197_v21, %v2193_v51  ;;  %2070 = vmatmul.f32.gmra.mxu3 %v3861_v3  ;;  %v1098_v40 = vadd.f32 %v1097_v23, %v1049_v17  ;;  %v2227_v3 = vor.u32 1.1754944e-38, %v2226_v0 }
 0x103   : > { %v2253_v8 = vmul.f32 %v2198_v20, %v4163_v55  ;;  %1948 = vmatmul.f32.gmra.mxu1 %v1721_v63  ;;  %v2216_v2 = vmul.f32 %v2484_v10, %v2153_v14  ;;  %vm2221_vm9 = vweird.f32 %v2484_v10  ;;  %v886_v63 = vadd.f32 %v885_v18, %v3845_v4 }
 0x104   : > { %v1179_v53 = vadd.f32 %v1178_v28, %v1098_v40  ;;  %v1223_v24 = vpop.f32.mrf.mxu3  ;;  %vm2222_vm10 = vmor %vm2220_vm8, %vm2221_vm9 }
 0x105   : > { %2259 = vst [vmem:[%s3976_s12 + $0x10] sm:$0xff] %v2253_v8  ;;  %v2217_v27 = vsub.f32 1.0, %v2216_v2  ;;  %v995_v22 = vadd.f32 %v994_v19, %v886_v63 }
 0x106   : > { %v1224_v30 = vadd.f32 %v1223_v24, %v1179_v53 }
 0x107   : > { %v2218_v42 = vmul.f32 %v2484_v10, %v2217_v27  ;;  %v1053_v49 = vpop.f32.mrf.mxu0 }
 0x108   : > { %v2440_v12 = vmul.f32 -1.442695, %v1224_v30  ;;  %v1054_v16 = vadd.f32 %v1053_v49, %v991_v38 }
 0x109   : > { %v2219_v61 = vadd.f32 %v2484_v10, %v2218_v42 }
 0x10a   : > { %2485 = vpow2.f32 %v2440_v12  ;;  %v1103_v48 = vpop.f32.mrf.mxu1 }
 0x10b   : > { %v2223_v60 = vsel %vm2222_vm10, %v2484_v10, %v2219_v61  ;;  %v1104_v9 = vadd.f32 %v1103_v48, %v1054_v16  ;;  %v1182_v26 = vpop.f32.mrf.mxu2 }
 0x10c   : > { %v2228_v37 = vsel %vm2225_vm11, %v2227_v3, %v2223_v60 }
 0x10d   : > { %v2255_v25 = vmul.f32 %v2228_v37, %v4164_v57  ;;  %v1183_v29 = vadd.f32 %v1182_v26, %v1104_v9 }
 0x10e   : > { %v1227_v31 = vpop.f32.mrf.mxu3 }
 0x10f   : > { %2261 = vst [vmem:[%s3976_s12 + $0x20] sm:$0xff] %v2255_v25  ;;  %v1228_v6 = vadd.f32 %v1227_v31, %v1183_v29 }
 0x110   : > { %v2486_v58 = vpop.eup %2485 }
 0x111   : > { %v2150_v5 = vadd.f32 1.0, %v2486_v58  ;;  %v2442_v45 = vmul.f32 -1.442695, %v1228_v6  ;;  %v1058_v32 = vpop.f32.mrf.mxu0  ;;  %v1267_v6 = vstv %s1266_s19 }
 0x112   : > { %v1059_v35 = vadd.f32 %v1058_v32, %v995_v22 }
 0x113   : > { %2487 = vrcp.f32 %v2150_v5  ;;  %v2181_v14 = vand.u32 2147483648, %v2150_v5  ;;  %v2179_v50 = vand.u32 2147483647, %v2150_v5  ;;  %vm2175_vm13 = vweird.f32 %v2150_v5 }
 0x114   : > { %2489 = vpow2.f32 %v2442_v45  ;;  %v1109_v4 = vpop.f32.mrf.mxu1 }
 0x115   : > { %v1110_v11 = vadd.f32 %v1109_v4, %v1059_v35  ;;  %v1186_v62 = vpop.f32.mrf.mxu2  ;;  %v2182_v41 = vor.u32 1.1754944e-38, %v2181_v14  ;;  %vm2180_vm15 = vcmp.eq.f32.partialorder %v2179_v50, 8.507059e+37 }
 0x117   : > { %v1187_v39 = vadd.f32 %v1186_v62, %v1110_v11 }
 0x118   : > { %v1231_v15 = vpop.f32.mrf.mxu3 }
 0x119   : > { %v2488_v18 = vpop.eup %2487  ;;  %v1232_v13 = vadd.f32 %v1231_v15, %v1187_v39 }
 0x11a   : > { %v2490_v44 = vpop.eup %2489  ;;  %v2171_v33 = vmul.f32 %v2488_v18, %v2150_v5  ;;  %vm2176_vm12 = vweird.f32 %v2488_v18 }
 0x11b   : > { %v2152_v36 = vadd.f32 1.0, %v2490_v44  ;;  %v2444_v34 = vmul.f32 -1.442695, %v1232_v13  ;;  %vm2177_vm14 = vmor %vm2175_vm13, %vm2176_vm12 }
 0x11c   : > { %v2172_v56 = vsub.f32 1.0, %v2171_v33 }
 0x11d   : > { %2491 = vrcp.f32 %v2152_v36  ;;  %v2211_v10 = vand.u32 2147483648, %v2152_v36  ;;  %v2209_v40 = vand.u32 2147483647, %v2152_v36  ;;  %vm2205_vm1 = vweird.f32 %v2152_v36 }
 0x11e   : > { %v2173_v1 = vmul.f32 %v2488_v18, %v2172_v56  ;;  %2493 = vpow2.f32 %v2444_v34 }
 0x11f   : > { %v2212_v8 = vor.u32 1.1754944e-38, %v2211_v10  ;;  %vm2210_vm3 = vcmp.eq.f32.partialorder %v2209_v40, 8.507059e+37 }
 0x120   : > { %v2174_v19 = vadd.f32 %v2488_v18, %v2173_v1 }
 0x122   : > { %v2178_v43 = vsel %vm2177_vm14, %v2488_v18, %v2174_v19 }
 0x123   : > { %v2492_v21 = vpop.eup %2491  ;;  %v2183_v17 = vsel %vm2180_vm15, %v2182_v41, %v2178_v43 }
 0x124   : > { %v2494_v46 = vpop.eup %2493  ;;  %v2252_v54 = vmul.f32 %v2183_v17, %v3736_v52  ;;  %v2201_v51 = vmul.f32 %v2492_v21, %v2152_v36  ;;  %vm2206_vm0 = vweird.f32 %v2492_v21 }
 0x125   : > { %v2154_v23 = vadd.f32 1.0, %v2494_v46  ;;  %vm2207_vm2 = vmor %vm2205_vm1, %vm2206_vm0  ;;  %v1306_v24 = vpop.f32.mrf.mxu0 }
 0x126   : > { %2258 = vst [vmem:[%s3976_s12 + $0x8] sm:$0xff] %v2252_v54  ;;  %v2202_v28 = vsub.f32 1.0, %v2201_v51  ;;  %v1307_v5 = vadd.f32 %v1306_v24, %v1267_v6 }
 0x127   : > { %2495 = vrcp.f32 %v2154_v23  ;;  %v2241_v59 = vand.u32 2147483648, %v2154_v23  ;;  %v2239_v42 = vand.u32 2147483647, %v2154_v23  ;;  %vm2235_vm5 = vweird.f32 %v2154_v23 }
 0x128   : > { %v2203_v20 = vmul.f32 %v2492_v21, %v2202_v28 }
 0x129   : > { %v2242_v3 = vor.u32 1.1754944e-38, %v2241_v59  ;;  %vm2240_vm7 = vcmp.eq.f32.partialorder %v2239_v42, 8.507059e+37 }
 0x12a   : > { %v2204_v55 = vadd.f32 %v2492_v21, %v2203_v20 }
 0x12c   : > { %v2208_v2 = vsel %vm2207_vm2, %v2492_v21, %v2204_v55 }
 0x12d   : > { %v2496_v0 = vpop.eup %2495  ;;  %v2213_v38 = vsel %vm2210_vm3, %v2212_v8, %v2208_v2 }
 0x12e   : > { %v2254_v52 = vmul.f32 %v2213_v38, %v3805_v7  ;;  %v2231_v53 = vmul.f32 %v2496_v0, %v2154_v23  ;;  %vm2236_vm4 = vweird.f32 %v2496_v0  ;;  %v1314_v7 = vpop.f32.mrf.mxu0 }
 0x12f   : > { %vm2237_vm6 = vmor %vm2235_vm5, %vm2236_vm4  ;;  %v1423_v16 = vpop.f32.mrf.mxu1  ;;  %v1485_v48 = vpop.f32.mrf.mxu2  ;;  %v1315_v4 = vadd.f32 %v1314_v7, %v1267_v6 }
 0x130   : > { %2260 = vst [vmem:[%s3976_s12 + $0x18] sm:$0xff] %v2254_v52  ;;  %v2232_v27 = vsub.f32 1.0, %v2231_v53  ;;  %v1424_v35 = vadd.f32 %v1423_v16, %v1307_v5 }
 0x132   : > { %v2233_v30 = vmul.f32 %v2496_v0, %v2232_v27  ;;  %v1534_v60 = vpop.f32.mrf.mxu3  ;;  %v1486_v11 = vadd.f32 %v1485_v48, %v1424_v35 }
 0x134   : > { %v2234_v49 = vadd.f32 %v2496_v0, %v2233_v30  ;;  %v1535_v39 = vadd.f32 %v1534_v60, %v1486_v11 }
 0x136   : > { %v2238_v12 = vsel %vm2237_vm6, %v2496_v0, %v2234_v49 }
 0x137   : > { %v2243_v61 = vsel %vm2240_vm7, %v2242_v3, %v2238_v12 }
 0x138   : > { %v2256_v63 = vmul.f32 %v2243_v61, %v3852_v47  ;;  %v1322_v26 = vpop.f32.mrf.mxu0 }
 0x139   : > { %v1427_v9 = vpop.f32.mrf.mxu1  ;;  %v1490_v37 = vpop.f32.mrf.mxu2  ;;  %v1323_v36 = vadd.f32 %v1322_v26, %v1267_v6 }
 0x13a   : > { %2262 = vst [vmem:[%s3976_s12 + $0x28] sm:$0xff] %v2256_v63  ;;  %v1428_v15 = vadd.f32 %v1427_v9, %v1315_v4 }
 0x13c   : > { %v1540_v57 = vpop.f32.mrf.mxu3  ;;  %v1491_v34 = vadd.f32 %v1490_v37, %v1428_v15 }
 0x13e   : > { %v1541_v1 = vadd.f32 %v1540_v57, %v1491_v34  ;;  %v2509_v34 = vld [vmem:[%s2818_s27] sm:$0xff] }
 0x142   : > { %v1431_v25 = vpop.f32.mrf.mxu1 }
 0x143   : > { %v1615_v29 = vpop.f32.mrf.mxu0  ;;  %v1495_v22 = vpop.f32.mrf.mxu2  ;;  %v1432_v50 = vadd.f32 %v1431_v25, %v1323_v36 }
 0x144   : > { %v1616_v44 = vadd.f32 %v1615_v29, %v1535_v39 }
 0x145   : > { %v1496_v17 = vadd.f32 %v1495_v22, %v1432_v50 }
 0x146   : > { %v1546_v31 = vpop.f32.mrf.mxu3 }
 0x147   : > { %v1547_v10 = vadd.f32 %v1546_v31, %v1496_v17 }
 0x14c   : > { %v1619_v45 = vpop.f32.mrf.mxu0 }
 0x14d   : > { %v1660_v58 = vpop.f32.mrf.mxu1  ;;  %v1709_v32 = vpop.f32.mrf.mxu2  ;;  %v1620_v43 = vadd.f32 %v1619_v45, %v1541_v1 }
 0x14e   : > { %v1661_v56 = vadd.f32 %v1660_v58, %v1616_v44 }
 0x150   : > { %v1826_v47 = vpop.f32.mrf.mxu3  ;;  %v1710_v19 = vadd.f32 %v1709_v32, %v1661_v56 }
 0x152   : > { %v1827_v46 = vadd.f32 %v1826_v47, %v1710_v19 }
 0x156   : > { %v1623_v18 = vpop.f32.mrf.mxu0 }
 0x157   : > { %v1664_v62 = vpop.f32.mrf.mxu1  ;;  %v1717_v13 = vpop.f32.mrf.mxu2  ;;  %v1624_v8 = vadd.f32 %v1623_v18, %v1547_v10 }
 0x158   : > { %v1665_v54 = vadd.f32 %v1664_v62, %v1620_v43 }
 0x15a   : > { %v1830_v33 = vpop.f32.mrf.mxu3  ;;  %v1718_v20 = vadd.f32 %v1717_v13, %v1665_v54 }
 0x15c   : > { %v1831_v38 = vadd.f32 %v1830_v33, %v1718_v20 }
 0x160   : > { %v1668_v14 = vpop.f32.mrf.mxu1 }
 0x161   : > { %v1725_v21 = vpop.f32.mrf.mxu2  ;;  %v1669_v52 = vadd.f32 %v1668_v14, %v1624_v8 }
 0x163   : > { %v1726_v42 = vadd.f32 %v1725_v21, %v1669_v52 }
 0x164   : > { %v1834_v51 = vpop.f32.mrf.mxu3 }
 0x165   : > { %v1835_v61 = vadd.f32 %v1834_v51, %v1726_v42  ;;  %v2510_v51 = vld [vmem:[%s2818_s27 + $0x8] sm:$0xff] }
 0x169   : > { %v1888_v41 = vpop.f32.mrf.mxu0 }
 0x16a   : > { %v1889_v23 = vadd.f32 %v1888_v41, %v1827_v46 }
 0x170   : > { %v1937_v28 = vpop.f32.mrf.mxu1 }
 0x171   : > { %v1938_v40 = vadd.f32 %v1937_v28, %v1889_v23  ;;  %v1893_v55 = vpop.f32.mrf.mxu0 }
 0x172   : > { %v1894_v27 = vadd.f32 %v1893_v55, %v1831_v38  ;;  %v2511_v38 = vld [vmem:[%s2818_s27 + $0x10] sm:$0xff] }
 0x173   : > { %v2018_v2 = vpop.f32.mrf.mxu2 }
 0x174   : > { %v2019_v0 = vadd.f32 %v2018_v2, %v1938_v40 }
 0x175   : > { %v2063_v53 = vpop.f32.mrf.mxu3 }
 0x176   : > { %v2064_v24 = vadd.f32 %v2063_v53, %v2019_v0 }
 0x178   : > { %v2436_v59 = vmul.f32 -1.442695, %v2064_v24  ;;  %v1943_v30 = vpop.f32.mrf.mxu1 }
 0x179   : > { %v1944_v49 = vadd.f32 %v1943_v30, %v1894_v27  ;;  %v1898_v12 = vpop.f32.mrf.mxu0 }
 0x17a   : > { %2497 = vpow2.f32 %v2436_v59  ;;  %v1899_v48 = vadd.f32 %v1898_v12, %v1835_v61 }
 0x17b   : > { %v2022_v3 = vpop.f32.mrf.mxu2 }
 0x17c   : > { %v2023_v16 = vadd.f32 %v2022_v3, %v1944_v49 }
 0x17d   : > { %v2067_v63 = vpop.f32.mrf.mxu3 }
 0x17e   : > { %v2068_v7 = vadd.f32 %v2067_v63, %v2023_v16 }
 0x180   : > { %v2498_v60 = vpop.eup %2497  ;;  %v2437_v9 = vmul.f32 -1.442695, %v2068_v7  ;;  %v1949_v26 = vpop.f32.mrf.mxu1 }
 0x181   : > { %v2083_v37 = vadd.f32 1.0, %v2498_v60  ;;  %v1950_v57 = vadd.f32 %v1949_v26, %v1899_v48 }
 0x182   : > { %2499 = vpow2.f32 %v2437_v9 }
 0x183   : > { %2501 = vrcp.f32 %v2083_v37  ;;  %v2026_v25 = vpop.f32.mrf.mxu2  ;;  %v2097_v47 = vand.u32 2147483648, %v2083_v37  ;;  %v2095_v11 = vand.u32 2147483647, %v2083_v37  ;;  %vm2091_vm9 = vweird.f32 %v2083_v37 }
 0x184   : > { %v2027_v29 = vadd.f32 %v2026_v25, %v1950_v57 }
 0x185   : > { %v2071_v22 = vpop.f32.mrf.mxu3  ;;  %v2098_v18 = vor.u32 1.1754944e-38, %v2097_v47  ;;  %vm2096_vm11 = vcmp.eq.f32.partialorder %v2095_v11, 8.507059e+37 }
 0x186   : > { %v2072_v31 = vadd.f32 %v2071_v22, %v2027_v29 }
 0x188   : > { %v2500_v6 = vpop.eup %2499  ;;  %v2438_v58 = vmul.f32 -1.442695, %v2072_v31 }
 0x189   : > { %v2502_v5 = vpop.eup %2501  ;;  %v2084_v45 = vadd.f32 1.0, %v2500_v6 }
 0x18a   : > { %v2087_v32 = vmul.f32 %v2502_v5, %v2083_v37  ;;  %2503 = vpow2.f32 %v2438_v58  ;;  %vm2092_vm8 = vweird.f32 %v2502_v5 }
 0x18b   : > { %2505 = vrcp.f32 %v2084_v45  ;;  %vm2093_vm10 = vmor %vm2091_vm9, %vm2092_vm8  ;;  %v2112_v1 = vand.u32 2147483648, %v2084_v45  ;;  %v2110_v19 = vand.u32 2147483647, %v2084_v45  ;;  %vm2106_vm13 = vweird.f32 %v2084_v45 }
 0x18c   : > { %v2088_v35 = vsub.f32 1.0, %v2087_v32 }
 0x18d   : > { %v2113_v21 = vor.u32 1.1754944e-38, %v2112_v1  ;;  %vm2111_vm15 = vcmp.eq.f32.partialorder %v2110_v19, 8.507059e+37 }
 0x18e   : > { %v2089_v4 = vmul.f32 %v2502_v5, %v2088_v35 }
 0x190   : > { %v2504_v62 = vpop.eup %2503  ;;  %v2090_v39 = vadd.f32 %v2502_v5, %v2089_v4 }
 0x191   : > { %v2506_v15 = vpop.eup %2505  ;;  %v2085_v13 = vadd.f32 1.0, %v2504_v62 }
 0x192   : > { %v2094_v44 = vsel %vm2093_vm10, %v2502_v5, %v2090_v39  ;;  %v2102_v33 = vmul.f32 %v2506_v15, %v2084_v45  ;;  %vm2107_vm12 = vweird.f32 %v2506_v15 }
 0x193   : > { %v2099_v36 = vsel %vm2096_vm11, %v2098_v18, %v2094_v44  ;;  %2507 = vrcp.f32 %v2085_v13  ;;  %vm2108_vm14 = vmor %vm2106_vm13, %vm2107_vm12  ;;  %v2127_v10 = vand.u32 2147483648, %v2085_v13  ;;  %v2125_v40 = vand.u32 2147483647, %v2085_v13 }
 0x194   : > { %v2245_v56 = vmul.f32 %v2509_v34, %v2099_v36  ;;  %v2103_v14 = vsub.f32 1.0, %v2102_v33  ;;  %vm2121_vm1 = vweird.f32 %v2085_v13 }
 0x195   : > { %v2128_v8 = vor.u32 1.1754944e-38, %v2127_v10  ;;  %vm2126_vm3 = vcmp.eq.f32.partialorder %v2125_v40, 8.507059e+37 }
 0x196   : > { %2248 = vst [vmem:[%s4006_s15] sm:$0xff] %v2245_v56  ;;  %v2104_v50 = vmul.f32 %v2506_v15, %v2103_v14 }
 0x198   : > { %v2105_v41 = vadd.f32 %v2506_v15, %v2104_v50 }
 0x199   : > { %v2508_v43 = vpop.eup %2507 }
 0x19a   : > { %v2109_v17 = vsel %vm2108_vm14, %v2506_v15, %v2105_v41  ;;  %v2117_v46 = vmul.f32 %v2508_v43, %v2085_v13  ;;  %vm2122_vm0 = vweird.f32 %v2508_v43 }
 0x19b   : > { %v2114_v54 = vsel %vm2111_vm15, %v2113_v21, %v2109_v17  ;;  %vm2123_vm2 = vmor %vm2121_vm1, %vm2122_vm0 }
 0x19c   : > { %v2246_v23 = vmul.f32 %v2510_v51, %v2114_v54  ;;  %v2118_v28 = vsub.f32 1.0, %v2117_v46 }
 0x19e   : > { %2249 = vst [vmem:[%s4006_s15 + $0x8] sm:$0xff] %v2246_v23  ;;  %v2119_v20 = vmul.f32 %v2508_v43, %v2118_v28 }
 0x1a0   : > { %v2120_v55 = vadd.f32 %v2508_v43, %v2119_v20 }
 0x1a2   : > { %v2124_v2 = vsel %vm2123_vm2, %v2508_v43, %v2120_v55 }
 0x1a3   : > { %v2129_v0 = vsel %vm2126_vm3, %v2128_v8, %v2124_v2 }
 0x1a4   : > { %v2247_v52 = vmul.f32 %v2511_v38, %v2129_v0 }
 0x1a6   : > { %2250 = vst [vmem:[%s4006_s15 + $0x10] sm:$0xff] %v2247_v52 }
 0x1a7 PF: > { %s20_s30 = sadd.s32 1, %s2534_s30   ;;  %s4165_s28 = smov %s2530_s29 }
 0x1a8   : > { %p17_p5 = scmp.ge.s32.totalorder %s20_s30, 4   ;;  %s4166_s29 = smov %s4168_s4 }
 0x1aa   :  { %19 = sbr.rel (!%p17_p5) target bundleno = 3 (0x3), region = 89 }

</bundles_post_ra>
